<compile_context>
chip_gen: v5e
topology: v5e:2x2
jax: 0.10.0
libtpu: 0.0.40
codegen_flags: <defaults>
</compile_context>

<pallas_src>
import functools
import math

import jax
import jax.numpy as jnp
from jax.experimental import pallas as pl
from jax.experimental.pallas import tpu as pltpu


# --------------------------------------------------------------------------------------
# Kernel
# --------------------------------------------------------------------------------------
def _graph_module_kernel(
    x_ref, adj_ref, mask_ref,
    w1c_ref, b1c_ref, w2b_ref, b2c_ref,
    ln_a_ref, ln_b_ref,
    ff_w1_ref, ff_b1_ref, ff_w2_ref, ff_b2_ref,
    out_ref,
    *, mm_dtype,
):
    bb, k, indim = x_ref.shape
    n = bb * k
    f32 = jnp.float32

    # All reshapes below only collapse/expand leading dims (K % 8 == 0, last dim
    # unchanged) so they are layout no-ops.
    x = x_ref[...]                              # (bb, K, indim) f32
    xf = x.reshape(n, indim)

    # ----- block-diagonal adjacency: one (n, n) operand instead of bb tiny einsums ----
    adj2 = adj_ref[...].reshape(n, k).astype(mm_dtype)          # (n, K)
    a_tiled = jnp.concatenate([adj2] * bb, axis=1)              # (n, n) lane-concat
    a_blk = a_tiled * mask_ref[...]                             # kron(I_bb, 1_KxK) mask

    # ----- fused GCN (both branches share one pair of wide matmuls) -------------------
    # gc1: support = x @ W1cat  (concat of both branches' W1)
    s1 = jnp.dot(xf.astype(mm_dtype), w1c_ref[...], preferred_element_type=f32)  # (n, 2H)
    h1 = jnp.maximum(
        jnp.dot(a_blk, s1.astype(mm_dtype), preferred_element_type=f32) + b1c_ref[...],
        0.0,
    )                                                                             # (n, 2H)
    # gc2: block-diagonal W2 -> this IS concat([GCN0, GCN1], -1)
    s2 = jnp.dot(h1.astype(mm_dtype), w2b_ref[...], preferred_element_type=f32)   # (n, out)
    cat = jnp.dot(a_blk, s2.astype(mm_dtype), preferred_element_type=f32) + b2c_ref[...]

    # ----- LayerNorm (torch custom: unbiased std, eps added to std), exact f32 --------
    d = cat.shape[-1]
    mean = jnp.mean(cat, axis=-1, keepdims=True)
    var_unbiased = jnp.sum((cat - mean) ** 2, axis=-1, keepdims=True) / (d - 1)
    ln = ln_a_ref[...] * (cat - mean) / (jnp.sqrt(var_unbiased) + 1e-6) + ln_b_ref[...]

    g = ln + xf                                  # residual (requires outdim == indim)

    # ----- PositionwiseFeedForward -----------------------------------------------------
    h = jnp.maximum(
        jnp.dot(g.astype(mm_dtype), ff_w1_ref[...], preferred_element_type=f32)
        + ff_b1_ref[...],
        0.0,
    )
    ff = (
        jnp.dot(h.astype(mm_dtype), ff_w2_ref[...], preferred_element_type=f32)
        + ff_b2_ref[...]
    )

    out_ref[...] = (ff + g).reshape(bb, k, -1)


# --------------------------------------------------------------------------------------
# Host-side helpers
# --------------------------------------------------------------------------------------
def fuse_gcn_params(p):
    """One-time fusion of the two GCN branches.

    concat W1s along the output axis; place the two W2s on a block-diagonal so that
    (x @ W1cat) and (h @ W2blk) reproduce concat([GCN0, GCN1], -1) exactly (the two
    branches share x/adj and their second-layer inputs are disjoint column ranges).
    """
    hid = p["g0_w1"].shape[1]
    d_k = p["g0_w2"].shape[1]
    w1c = jnp.concatenate([p["g0_w1"], p["g1_w1"]], axis=1)            # (indim, 2*hid)
    b1c = jnp.concatenate([p["g0_b1"], p["g1_b1"]], axis=1)            # (1, 2*hid)
    w2b = jnp.zeros((2 * hid, 2 * d_k), jnp.float32)
    w2b = w2b.at[:hid, :d_k].set(p["g0_w2"]).at[hid:, d_k:].set(p["g1_w2"])
    b2c = jnp.concatenate([p["g0_b2"], p["g1_b2"]], axis=1)            # (1, 2*d_k)
    return w1c, b1c, w2b, b2c


def _choose_block_b(B, K, indim, outdim, hid2, ffh, mm_bytes, vmem_budget_bytes):
    """Largest divisor of B whose per-step footprint fits the VMEM budget.

    Default = B (single grid step): at small/medium shapes the kernel is per-step
    overhead bound and v5e/v6e have a single TensorCore, so more steps only cost.
    """
    w_bytes = mm_bytes * (indim * hid2 + hid2 * outdim + indim * ffh + ffh * outdim)
    for bb in range(B, 0, -1):
        if B % bb:
            continue
        n = bb * K
        io = 2 * 4 * n * (indim + K + outdim)     # double-buffered x / adj / out blocks (f32)
        mask = 2 * mm_bytes * n * n               # (n, n) block-diag mask block
        amat = mm_bytes * n * n                   # in-kernel A operand
        act = 4 * n * (2 * hid2 + 4 * outdim)     # s1/h1/cat/g/ff temporaries (f32)
        if w_bytes + io + mask + amat + act <= vmem_budget_bytes:
            return bb
    return 1


def graph_module_forward(graph_nodes, graph, params, *, block_b=None, use_bf16=True):
    """graph_nodes: (B, K, indim) f32, graph: (B, >=5, K, K).  Returns (adj, out).

    use_bf16: cast matmul operands/weights to bf16 (f32 accumulation) — the MXU fast
    path on v6e/v7x and half the weight DMA; LN stats / biases / residuals stay f32.
    block_b: batch elements per grid step.  Default: single step (best on 1-TC
    v5e/v6e and at small shapes); pass B//2 on v7x for large B to use both cores.
    """
    B, K, indim = graph_nodes.shape
    assert graph.ndim == 4 and graph.shape[0] == B and graph.shape[2:] == (K, K)
    assert graph.shape[1] >= 5, "forward reads relation slice graph[:, 4]; need >= 5 relations"
    assert K % 8 == 0, "K must be a multiple of 8 so in-kernel batch flattening is a layout no-op"

    w1c, b1c, w2b, b2c = fuse_gcn_params(params)
    hid2 = w1c.shape[1]
    outdim = w2b.shape[1]
    ffh = params["ff_w1"].shape[1]
    assert indim == outdim, "residual adds require indim == outdim (as in the torch module)"

    mm_dtype = jnp.bfloat16 if use_bf16 else jnp.float32
    mm_bytes = 2 if use_bf16 else 4

    # Pre-sliced adjacency (review item 1): the (B, K, K) f32 slice is returned anyway,
    # so feed exactly that to the kernel instead of casting the whole (B, R, K, K) graph.
    adj = graph[:, 4, :, :].astype(jnp.float32)

    if block_b is None:
        block_b = _choose_block_b(B, K, indim, outdim, hid2, ffh, mm_bytes,
                                  vmem_budget_bytes=24 << 20)
    assert B % block_b == 0
    bb = block_b
    grid = (B // bb,)
    n = bb * K

    # Static block-diagonal mask kron(I_bb, ones(K,K)): host-built once, constant
    # block index across grid steps.  Lets the kernel use one (n,n)@(n,H) contraction
    # per adjacency application with zero in-kernel integer index math.
    mask = jnp.kron(jnp.eye(bb, dtype=jnp.float32),
                    jnp.ones((K, K), jnp.float32)).astype(mm_dtype)

    # Matmul weights at mm_dtype (review item 4); biases / LN params stay f32.
    w1c_c, w2b_c = w1c.astype(mm_dtype), w2b.astype(mm_dtype)
    ff_w1_c = params["ff_w1"].astype(mm_dtype)
    ff_w2_c = params["ff_w2"].astype(mm_dtype)

    def batched(shape):
        return pl.BlockSpec(shape, lambda b: (b,) + (0,) * (len(shape) - 1))

    def whole(arr):
        nd = arr.ndim
        return pl.BlockSpec(arr.shape, lambda b: (0,) * nd)

    in_specs = [
        batched((bb, K, indim)),                                 # x
        batched((bb, K, K)),                                     # adj (pre-sliced)
        whole(mask),                                             # block-diag mask
        whole(w1c_c), whole(b1c), whole(w2b_c), whole(b2c),      # fused GCN weights
        whole(params["ln_a"]), whole(params["ln_b"]),
        whole(ff_w1_c), whole(params["ff_b1"]),
        whole(ff_w2_c), whole(params["ff_b2"]),
    ]

    # Advisory cost estimate (actual MXU work incl. block-diag zero columns; exact DMA bytes).
    flops = int(2 * B * K * (indim * hid2 + n * hid2 + hid2 * outdim
                             + n * outdim + outdim * ffh + ffh * outdim))
    bytes_accessed = int(
        4 * (B * K * indim + B * K * K + B * K * outdim)
        + mm_bytes * (mask.size + w1c.size + w2b.size
                      + params["ff_w1"].size + params["ff_w2"].size)
        + 4 * (b1c.size + b2c.size + params["ln_a"].size + params["ln_b"].size
               + params["ff_b1"].size + params["ff_b2"].size)
    )

    out = pl.pallas_call(
        functools.partial(_graph_module_kernel, mm_dtype=mm_dtype),
        out_shape=jax.ShapeDtypeStruct((B, K, outdim), jnp.float32),
        grid_spec=pltpu.PrefetchScalarGridSpec(
            num_scalar_prefetch=0,
            grid=grid,
            in_specs=in_specs,
            out_specs=batched((bb, K, outdim)),
        ),
        compiler_params=pltpu.CompilerParams(
            dimension_semantics=(("parallel",) if grid[0] > 1 else ("arbitrary",))
        ),
        cost_estimate=pl.CostEstimate(
            flops=flops, transcendentals=int(B * K), bytes_accessed=bytes_accessed
        ),
    )(
        graph_nodes.astype(jnp.float32), adj, mask,
        w1c_c, b1c, w2b_c, b2c,
        params["ln_a"], params["ln_b"],
        ff_w1_c, params["ff_b1"], ff_w2_c, params["ff_b2"],
    )
    return adj, out


# --------------------------------------------------------------------------------------
# Parameter init + pure-JAX reference
# --------------------------------------------------------------------------------------
def init_params(key, indim, hiddim, outdim):
    """Deterministic parameter init matching the torch module's shapes."""
    d_k = outdim // 2
    ks = jax.random.split(key, 12)

    def unif(k, shape, fan):
        stdv = 1.0 / math.sqrt(fan)
        return jax.random.uniform(k, shape, jnp.float32, -stdv, stdv)

    return {
        # GCN 0
        "g0_w1": unif(ks[0], (indim, hiddim), hiddim),
        "g0_b1": unif(ks[1], (1, hiddim), hiddim),
        "g0_w2": unif(ks[2], (hiddim, d_k), d_k),
        "g0_b2": unif(ks[3], (1, d_k), d_k),
        # GCN 1
        "g1_w1": unif(ks[4], (indim, hiddim), hiddim),
        "g1_b1": unif(ks[5], (1, hiddim), hiddim),
        "g1_w2": unif(ks[6], (hiddim, d_k), d_k),
        "g1_b2": unif(ks[7], (1, d_k), d_k),
        # LayerNorm(outdim)
        "ln_a": jnp.ones((1, outdim), jnp.float32),
        "ln_b": jnp.zeros((1, outdim), jnp.float32),
        # FFN Linear weights stored pre-transposed as (in, out) so kernel does x @ W.
        "ff_w1": unif(ks[8], (indim, hiddim), indim),
        "ff_b1": unif(ks[9], (1, hiddim), indim),
        "ff_w2": unif(ks[10], (hiddim, outdim), hiddim),
        "ff_b2": unif(ks[11], (1, outdim), hiddim),
    }


def reference_forward(graph_nodes, graph, p, mm_dtype=jnp.float32):
    """Pure-JAX reference (unfused branches, plain concat, per-batch einsums).

    `mm_dtype` applies the SAME operand casts at the SAME points as the kernel, so
    the comparison verifies the kernel's fusion/structure independent of precision.
    """
    f32 = jnp.float32
    cast = lambda a: a.astype(mm_dtype)
    adj = graph[:, 4, :, :].astype(f32)
    adj_mm = cast(adj)

    def gcn(x, w1, b1, w2, b2):
        s1 = jnp.dot(cast(x), cast(w1), preferred_element_type=f32)
        h1 = jax.nn.relu(
            jnp.einsum("bij,bjh->bih", adj_mm, cast(s1), preferred_element_type=f32) + b1)
        s2 = jnp.dot(cast(h1), cast(w2), preferred_element_type=f32)
        return jnp.einsum("bij,bjh->bih", adj_mm, cast(s2), preferred_element_type=f32) + b2

    o0 = gcn(graph_nodes, p["g0_w1"], p["g0_b1"], p["g0_w2"], p["g0_b2"])
    o1 = gcn(graph_nodes, p["g1_w1"], p["g1_b1"], p["g1_w2"], p["g1_b2"])
    cat = jnp.concatenate([o0, o1], axis=-1)
    mean = cat.mean(-1, keepdims=True)
    std = jnp.sqrt(((cat - mean) ** 2).sum(-1, keepdims=True) / (cat.shape[-1] - 1))
    ln = p["ln_a"] * (cat - mean) / (std + 1e-6) + p["ln_b"]
    g = ln + graph_nodes
    h = jax.nn.relu(
        jnp.dot(cast(g), cast(p["ff_w1"]), preferred_element_type=f32) + p["ff_b1"])
    out = jnp.dot(cast(h), cast(p["ff_w2"]), preferred_element_type=f32) + p["ff_b2"] + g
    return adj, out


# --------------------------------------------------------------------------------------
# Demo / self-check
# --------------------------------------------------------------------------------------
if __name__ == "__main__":
    # Small shapes consistent with the module: indim == outdim (residual adds), K % 8 == 0.
    B, K, indim, hiddim, outdim = 8, 8, 32, 32, 32

    key = jax.random.PRNGKey(0)
    k_x, k_g, k_p = jax.random.split(key, 3)

    graph_nodes = jax.random.normal(k_x, (B, K, indim), jnp.float32)
    graph = jax.random.normal(k_g, (B, 5, K, K), jnp.float32)   # >=5 relation slices
    params = init_params(k_p, indim, hiddim, outdim)

    # ---- default perf path: bf16 MXU operands, f32 accumulation / LN / residuals ----
    adj, out = graph_module_forward(graph_nodes, graph, params)          # use_bf16=True
    jax.block_until_ready(out)
    assert out.shape == (B, K, outdim) and out.dtype == jnp.float32

    adj_ref, out_ref = reference_forward(graph_nodes, graph, params, mm_dtype=jnp.bfloat16)
    assert jnp.allclose(adj, adj_ref), "adj mismatch"
    # Kernel and reference apply identical explicit bf16 casts with f32 accumulation,
    # so only accumulation-order noise remains -> tight check.
    assert jnp.allclose(out, out_ref, atol=5e-3, rtol=5e-3), "bf16-path mismatch vs reference"

    # ---- f32 fallback path (use_bf16=False) ----
    _, out32 = graph_module_forward(graph_nodes, graph, params, use_bf16=False)
    jax.block_until_ready(out32)
    _, out_ref32 = reference_forward(graph_nodes, graph, params, mm_dtype=jnp.float32)
    # Loose sanity bound only: at default precision, f32 matmuls use bf16 passes on
    # the TPU backend but exact f32 in interpret/CPU, so kernel and reference may
    # legitimately differ at the ~1e-2 level here.
    assert jnp.allclose(out32, out_ref32, atol=1e-1, rtol=1e-1), "f32-path sanity check failed"

    print("KERNEL_OK")
</pallas_src>

<mosaic_0001>
module attributes {stable_mosaic.version = 11 : i64} {
  func.func @_graph_module_kernel(%arg0: i32, %arg1: memref<8x8x32xf32, #tpu.memory_space<vmem>>, %arg2: memref<8x8x8xf32, #tpu.memory_space<vmem>>, %arg3: memref<64x64xbf16, #tpu.memory_space<vmem>>, %arg4: memref<32x64xbf16, #tpu.memory_space<vmem>>, %arg5: memref<1x64xf32, #tpu.memory_space<vmem>>, %arg6: memref<64x32xbf16, #tpu.memory_space<vmem>>, %arg7: memref<1x32xf32, #tpu.memory_space<vmem>>, %arg8: memref<1x32xf32, #tpu.memory_space<vmem>>, %arg9: memref<1x32xf32, #tpu.memory_space<vmem>>, %arg10: memref<32x32xbf16, #tpu.memory_space<vmem>>, %arg11: memref<1x32xf32, #tpu.memory_space<vmem>>, %arg12: memref<32x32xbf16, #tpu.memory_space<vmem>>, %arg13: memref<1x32xf32, #tpu.memory_space<vmem>>, %arg14: memref<8x8x32xf32, #tpu.memory_space<vmem>>) attributes {dimension_semantics = [#tpu.dimension_semantics<arbitrary>], iteration_bounds = array<i64: 1>, scalar_prefetch = 0 : i64, scratch_operands = 0 : i64, tpu.core_type = #tpu.core_type<tc>, window_params = [{transform_indices = @transform_0, window_bounds = array<i64: 8, 8, 32>}, {transform_indices = @transform_1, window_bounds = array<i64: 8, 8, 8>}, {pipeline_mode = #tpu.pipeline_mode<synchronous>, transform_indices = @transform_2, window_bounds = array<i64: 64, 64>}, {pipeline_mode = #tpu.pipeline_mode<synchronous>, transform_indices = @transform_3, window_bounds = array<i64: 32, 64>}, {pipeline_mode = #tpu.pipeline_mode<synchronous>, transform_indices = @transform_4, window_bounds = array<i64: 1, 64>}, {pipeline_mode = #tpu.pipeline_mode<synchronous>, transform_indices = @transform_5, window_bounds = array<i64: 64, 32>}, {pipeline_mode = #tpu.pipeline_mode<synchronous>, transform_indices = @transform_6, window_bounds = array<i64: 1, 32>}, {pipeline_mode = #tpu.pipeline_mode<synchronous>, transform_indices = @transform_7, window_bounds = array<i64: 1, 32>}, {pipeline_mode = #tpu.pipeline_mode<synchronous>, transform_indices = @transform_8, window_bounds = array<i64: 1, 32>}, {pipeline_mode = #tpu.pipeline_mode<synchronous>, transform_indices = @transform_9, window_bounds = array<i64: 32, 32>}, {pipeline_mode = #tpu.pipeline_mode<synchronous>, transform_indices = @transform_10, window_bounds = array<i64: 1, 32>}, {pipeline_mode = #tpu.pipeline_mode<synchronous>, transform_indices = @transform_11, window_bounds = array<i64: 32, 32>}, {pipeline_mode = #tpu.pipeline_mode<synchronous>, transform_indices = @transform_12, window_bounds = array<i64: 1, 32>}, {transform_indices = @transform_13, window_bounds = array<i64: 8, 8, 32>}]} {
    %c0 = arith.constant 0 : index
    %c0_0 = arith.constant 0 : index
    %c0_1 = arith.constant 0 : index
    %0 = vector.load %arg1[%c0, %c0_0, %c0_1] : memref<8x8x32xf32, #tpu.memory_space<vmem>>, vector<8x8x32xf32>
    %1 = vector.shape_cast %0 : vector<8x8x32xf32> to vector<64x32xf32>
    %c0_2 = arith.constant 0 : index
    %c0_3 = arith.constant 0 : index
    %c0_4 = arith.constant 0 : index
    %2 = vector.load %arg2[%c0_2, %c0_3, %c0_4] : memref<8x8x8xf32, #tpu.memory_space<vmem>>, vector<8x8x8xf32>
    %3 = vector.shape_cast %2 : vector<8x8x8xf32> to vector<64x8xf32>
    %4 = arith.truncf %3 : vector<64x8xf32> to vector<64x8xbf16>
    %5 = tpu.concatenate %4, %4, %4, %4, %4, %4, %4, %4 in 1 : vector<64x8xbf16>, vector<64x8xbf16>, vector<64x8xbf16>, vector<64x8xbf16>, vector<64x8xbf16>, vector<64x8xbf16>, vector<64x8xbf16>, vector<64x8xbf16> -> vector<64x64xbf16>
    %c0_5 = arith.constant 0 : index
    %c0_6 = arith.constant 0 : index
    %6 = vector.load %arg3[%c0_5, %c0_6] : memref<64x64xbf16, #tpu.memory_space<vmem>>, vector<64x64xbf16>
    %7 = arith.mulf %5, %6 : vector<64x64xbf16>
    %8 = arith.truncf %1 : vector<64x32xf32> to vector<64x32xbf16>
    %c0_7 = arith.constant 0 : index
    %c0_8 = arith.constant 0 : index
    %9 = vector.load %arg4[%c0_7, %c0_8] : memref<32x64xbf16, #tpu.memory_space<vmem>>, vector<32x64xbf16>
    %cst = arith.constant dense<0.000000e+00> : vector<64x64xf32>
    %10 = tpu.matmul %8, %9, %cst {dimension_numbers = #tpu.dot_dimension_numbers<[1], [0], [0], [1], [0, 0, 1, 1], [], []>} : vector<64x32xbf16>, vector<32x64xbf16>, vector<64x64xf32> -> vector<64x64xf32>
    %11 = arith.truncf %10 : vector<64x64xf32> to vector<64x64xbf16>
    %cst_9 = arith.constant dense<0.000000e+00> : vector<64x64xf32>
    %12 = tpu.matmul %7, %11, %cst_9 {dimension_numbers = #tpu.dot_dimension_numbers<[1], [0], [0], [1], [0, 0, 1, 1], [], []>} : vector<64x64xbf16>, vector<64x64xbf16>, vector<64x64xf32> -> vector<64x64xf32>
    %c0_10 = arith.constant 0 : index
    %c0_11 = arith.constant 0 : index
    %13 = vector.load %arg5[%c0_10, %c0_11] : memref<1x64xf32, #tpu.memory_space<vmem>>, vector<1x64xf32>
    %14 = vector.broadcast %13 : vector<1x64xf32> to vector<64x64xf32>
    %15 = arith.addf %12, %14 : vector<64x64xf32>
    %cst_12 = arith.constant 0.000000e+00 : f32
    %16 = vector.broadcast %cst_12 : f32 to vector<64x64xf32>
    %17 = arith.maximumf %15, %16 : vector<64x64xf32>
    %18 = arith.truncf %17 : vector<64x64xf32> to vector<64x64xbf16>
    %c0_13 = arith.constant 0 : index
    %c0_14 = arith.constant 0 : index
    %19 = vector.load %arg6[%c0_13, %c0_14] : memref<64x32xbf16, #tpu.memory_space<vmem>>, vector<64x32xbf16>
    %cst_15 = arith.constant dense<0.000000e+00> : vector<64x32xf32>
    %20 = tpu.matmul %18, %19, %cst_15 {dimension_numbers = #tpu.dot_dimension_numbers<[1], [0], [0], [1], [0, 0, 1, 1], [], []>} : vector<64x64xbf16>, vector<64x32xbf16>, vector<64x32xf32> -> vector<64x32xf32>
    %21 = arith.truncf %20 : vector<64x32xf32> to vector<64x32xbf16>
    %cst_16 = arith.constant dense<0.000000e+00> : vector<64x32xf32>
    %22 = tpu.matmul %7, %21, %cst_16 {dimension_numbers = #tpu.dot_dimension_numbers<[1], [0], [0], [1], [0, 0, 1, 1], [], []>} : vector<64x64xbf16>, vector<64x32xbf16>, vector<64x32xf32> -> vector<64x32xf32>
    %c0_17 = arith.constant 0 : index
    %c0_18 = arith.constant 0 : index
    %23 = vector.load %arg7[%c0_17, %c0_18] : memref<1x32xf32, #tpu.memory_space<vmem>>, vector<1x32xf32>
    %24 = vector.broadcast %23 : vector<1x32xf32> to vector<64x32xf32>
    %25 = arith.addf %22, %24 : vector<64x32xf32>
    %cst_19 = arith.constant dense<0.000000e+00> : vector<64xf32>
    %26 = vector.multi_reduction <add>, %25, %cst_19 [1] : vector<64x32xf32> to vector<64xf32>
    %27 = vector.shape_cast %26 : vector<64xf32> to vector<64x1xf32>
    %cst_20 = arith.constant 3.200000e+01 : f32
    %28 = vector.broadcast %cst_20 : f32 to vector<64x1xf32>
    %29 = arith.divf %27, %28 : vector<64x1xf32>
    %30 = vector.broadcast %29 : vector<64x1xf32> to vector<64x32xf32>
    %31 = arith.subf %25, %30 : vector<64x32xf32>
    %32 = arith.mulf %31, %31 : vector<64x32xf32>
    %cst_21 = arith.constant dense<0.000000e+00> : vector<64xf32>
    %33 = vector.multi_reduction <add>, %32, %cst_21 [1] : vector<64x32xf32> to vector<64xf32>
    %34 = vector.shape_cast %33 : vector<64xf32> to vector<64x1xf32>
    %cst_22 = arith.constant 3.100000e+01 : f32
    %35 = vector.broadcast %cst_22 : f32 to vector<64x1xf32>
    %36 = arith.divf %34, %35 : vector<64x1xf32>
    %c0_23 = arith.constant 0 : index
    %c0_24 = arith.constant 0 : index
    %37 = vector.load %arg8[%c0_23, %c0_24] : memref<1x32xf32, #tpu.memory_space<vmem>>, vector<1x32xf32>
    %38 = vector.broadcast %29 : vector<64x1xf32> to vector<64x32xf32>
    %39 = arith.subf %25, %38 : vector<64x32xf32>
    %40 = vector.broadcast %37 : vector<1x32xf32> to vector<64x32xf32>
    %41 = arith.mulf %40, %39 : vector<64x32xf32>
    %42 = math.sqrt %36 : vector<64x1xf32>
    %cst_25 = arith.constant 9.99999997E-7 : f32
    %43 = vector.broadcast %cst_25 : f32 to vector<64x1xf32>
    %44 = arith.addf %42, %43 : vector<64x1xf32>
    %45 = vector.broadcast %44 : vector<64x1xf32> to vector<64x32xf32>
    %46 = arith.divf %41, %45 : vector<64x32xf32>
    %c0_26 = arith.constant 0 : index
    %c0_27 = arith.constant 0 : index
    %47 = vector.load %arg9[%c0_26, %c0_27] : memref<1x32xf32, #tpu.memory_space<vmem>>, vector<1x32xf32>
    %48 = vector.broadcast %47 : vector<1x32xf32> to vector<64x32xf32>
    %49 = arith.addf %46, %48 : vector<64x32xf32>
    %50 = arith.addf %49, %1 : vector<64x32xf32>
    %51 = arith.truncf %50 : vector<64x32xf32> to vector<64x32xbf16>
    %c0_28 = arith.constant 0 : index
    %c0_29 = arith.constant 0 : index
    %52 = vector.load %arg10[%c0_28, %c0_29] : memref<32x32xbf16, #tpu.memory_space<vmem>>, vector<32x32xbf16>
    %cst_30 = arith.constant dense<0.000000e+00> : vector<64x32xf32>
    %53 = tpu.matmul %51, %52, %cst_30 {dimension_numbers = #tpu.dot_dimension_numbers<[1], [0], [0], [1], [0, 0, 1, 1], [], []>} : vector<64x32xbf16>, vector<32x32xbf16>, vector<64x32xf32> -> vector<64x32xf32>
    %c0_31 = arith.constant 0 : index
    %c0_32 = arith.constant 0 : index
    %54 = vector.load %arg11[%c0_31, %c0_32] : memref<1x32xf32, #tpu.memory_space<vmem>>, vector<1x32xf32>
    %55 = vector.broadcast %54 : vector<1x32xf32> to vector<64x32xf32>
    %56 = arith.addf %53, %55 : vector<64x32xf32>
    %cst_33 = arith.constant 0.000000e+00 : f32
    %57 = vector.broadcast %cst_33 : f32 to vector<64x32xf32>
    %58 = arith.maximumf %56, %57 : vector<64x32xf32>
    %59 = arith.truncf %58 : vector<64x32xf32> to vector<64x32xbf16>
    %c0_34 = arith.constant 0 : index
    %c0_35 = arith.constant 0 : index
    %60 = vector.load %arg12[%c0_34, %c0_35] : memref<32x32xbf16, #tpu.memory_space<vmem>>, vector<32x32xbf16>
    %cst_36 = arith.constant dense<0.000000e+00> : vector<64x32xf32>
    %61 = tpu.matmul %59, %60, %cst_36 {dimension_numbers = #tpu.dot_dimension_numbers<[1], [0], [0], [1], [0, 0, 1, 1], [], []>} : vector<64x32xbf16>, vector<32x32xbf16>, vector<64x32xf32> -> vector<64x32xf32>
    %c0_37 = arith.constant 0 : index
    %c0_38 = arith.constant 0 : index
    %62 = vector.load %arg13[%c0_37, %c0_38] : memref<1x32xf32, #tpu.memory_space<vmem>>, vector<1x32xf32>
    %63 = vector.broadcast %62 : vector<1x32xf32> to vector<64x32xf32>
    %64 = arith.addf %61, %63 : vector<64x32xf32>
    %65 = arith.addf %64, %50 : vector<64x32xf32>
    %66 = vector.shape_cast %65 : vector<64x32xf32> to vector<8x8x32xf32>
    %c0_39 = arith.constant 0 : index
    %c0_40 = arith.constant 0 : index
    %c0_41 = arith.constant 0 : index
    %67 = vector.load %arg14[%c0_39, %c0_40, %c0_41] : memref<8x8x32xf32, #tpu.memory_space<vmem>>, vector<8x8x32xf32>
    tpu.vector_store %arg14[%c0_39, %c0_40, %c0_41], %66 {strides = array<i32>} : memref<8x8x32xf32, #tpu.memory_space<vmem>>, vector<8x8x32xf32>,
    return
  }
  func.func @transform_0(%arg0: i32) -> (i32, i32, i32) {
    %c0_i32 = arith.constant 0 : i32
    %c0_i32_0 = arith.constant 0 : i32
    %c0_i32_1 = arith.constant 0 : i32
    return %arg0, %c0_i32, %c0_i32_0 : i32, i32, i32
  }
  func.func @transform_1(%arg0: i32) -> (i32, i32, i32) {
    %c0_i32 = arith.constant 0 : i32
    %c0_i32_0 = arith.constant 0 : i32
    %c0_i32_1 = arith.constant 0 : i32
    return %arg0, %c0_i32, %c0_i32_0 : i32, i32, i32
  }
  func.func @transform_2(%arg0: i32) -> (i32, i32) {
    %c0_i32 = arith.constant 0 : i32
    %c0_i32_0 = arith.constant 0 : i32
    %c0_i32_1 = arith.constant 0 : i32
    return %c0_i32, %c0_i32_0 : i32, i32
  }
  func.func @transform_3(%arg0: i32) -> (i32, i32) {
    %c0_i32 = arith.constant 0 : i32
    %c0_i32_0 = arith.constant 0 : i32
    %c0_i32_1 = arith.constant 0 : i32
    return %c0_i32, %c0_i32_0 : i32, i32
  }
  func.func @transform_4(%arg0: i32) -> (i32, i32) {
    %c0_i32 = arith.constant 0 : i32
    %c0_i32_0 = arith.constant 0 : i32
    %c0_i32_1 = arith.constant 0 : i32
    return %c0_i32, %c0_i32_0 : i32, i32
  }
  func.func @transform_5(%arg0: i32) -> (i32, i32) {
    %c0_i32 = arith.constant 0 : i32
    %c0_i32_0 = arith.constant 0 : i32
    %c0_i32_1 = arith.constant 0 : i32
    return %c0_i32, %c0_i32_0 : i32, i32
  }
  func.func @transform_6(%arg0: i32) -> (i32, i32) {
    %c0_i32 = arith.constant 0 : i32
    %c0_i32_0 = arith.constant 0 : i32
    %c0_i32_1 = arith.constant 0 : i32
    return %c0_i32, %c0_i32_0 : i32, i32
  }
  func.func @transform_7(%arg0: i32) -> (i32, i32) {
    %c0_i32 = arith.constant 0 : i32
    %c0_i32_0 = arith.constant 0 : i32
    %c0_i32_1 = arith.constant 0 : i32
    return %c0_i32, %c0_i32_0 : i32, i32
  }
  func.func @transform_8(%arg0: i32) -> (i32, i32) {
    %c0_i32 = arith.constant 0 : i32
    %c0_i32_0 = arith.constant 0 : i32
    %c0_i32_1 = arith.constant 0 : i32
    return %c0_i32, %c0_i32_0 : i32, i32
  }
  func.func @transform_9(%arg0: i32) -> (i32, i32) {
    %c0_i32 = arith.constant 0 : i32
    %c0_i32_0 = arith.constant 0 : i32
    %c0_i32_1 = arith.constant 0 : i32
    return %c0_i32, %c0_i32_0 : i32, i32
  }
  func.func @transform_10(%arg0: i32) -> (i32, i32) {
    %c0_i32 = arith.constant 0 : i32
    %c0_i32_0 = arith.constant 0 : i32
    %c0_i32_1 = arith.constant 0 : i32
    return %c0_i32, %c0_i32_0 : i32, i32
  }
  func.func @transform_11(%arg0: i32) -> (i32, i32) {
    %c0_i32 = arith.constant 0 : i32
    %c0_i32_0 = arith.constant 0 : i32
    %c0_i32_1 = arith.constant 0 : i32
    return %c0_i32, %c0_i32_0 : i32, i32
  }
  func.func @transform_12(%arg0: i32) -> (i32, i32) {
    %c0_i32 = arith.constant 0 : i32
    %c0_i32_0 = arith.constant 0 : i32
    %c0_i32_1 = arith.constant 0 : i32
    return %c0_i32, %c0_i32_0 : i32, i32
  }
  func.func @transform_13(%arg0: i32) -> (i32, i32, i32) {
    %c0_i32 = arith.constant 0 : i32
    %c0_i32_0 = arith.constant 0 : i32
    %c0_i32_1 = arith.constant 0 : i32
    return %arg0, %c0_i32, %c0_i32_0 : i32, i32, i32
  }
}

</mosaic_0001>

<bundles_post_ra>
// kernel: tpu_custom_call.1
= control target key start
LH: loop header
LB: loop body
LE: loop exit
PB: predicated region body
PF: predicated region fallthrough
CT: control target
= control target key end

     0   :  { %18 = vsyncpa [#allocation3], 0  ;;  %s1856_s0 = inlined_call_operand.hbm [shape: f32[8,8,32], index: 0, kind: input, shape index: {}]   ;;  %s1857_s1 = inlined_call_operand.hbm [shape: f32[8,8,8], index: 1, kind: input, shape index: {}]   ;;  %s1858_s2 = inlined_call_operand.vmem [shape: bf16[64,64], index: 2, kind: input, shape index: {}]   ;;  %s1859_s3 = inlined_call_operand.vmem [shape: bf16[32,64], index: 3, kind: input, shape index: {}]   ;;  %s1860_s4 = inlined_call_operand.vmem [shape: f32[1,64], index: 4, kind: input, shape index: {}]   ;;  %s1861_s5 = inlined_call_operand.vmem [shape: bf16[64,32], index: 5, kind: input, shape index: {}]   ;;  %s1862_s6 = inlined_call_operand.vmem [shape: f32[1,32], index: 6, kind: input, shape index: {}]   ;;  %s1863_s7 = inlined_call_operand.vmem [shape: f32[1,32], index: 7, kind: input, shape index: {}]   ;;  %s1864_s8 = inlined_call_operand.vmem [shape: f32[1,32], index: 8, kind: input, shape index: {}]   ;;  %s1865_s9 = inlined_call_operand.hbm [shape: bf16[32,32], index: 9, kind: input, shape index: {}]   ;;  %s1866_s10 = inlined_call_operand.vmem [shape: f32[1,32], index: 10, kind: input, shape index: {}]   ;;  %s1867_s11 = inlined_call_operand.hbm [shape: bf16[32,32], index: 11, kind: input, shape index: {}]   ;;  %s1868_s12 = inlined_call_operand.vmem [shape: f32[1,32], index: 12, kind: input, shape index: {}]   ;;  %s1869_s13 = inlined_call_operand.hbm [shape: f32[8,8,32], index: 13, kind: output, shape index: {}]  }
   0x1   :  { %19 = vsyncpa [#allocation6], 0 }
   0x2   :  { %20 = vsyncpa [#allocation9], 0 }
   0x3   :  { %21 = vsyncpa [#allocation4], 0  ;;  %s39_s27 = sshll.u32 %s1857_s1, 4  ;;  %s1366_s28 = smov [#allocation5]   ;;  %s40_s27 = int_to_ptr.hbm [resolvable:$true] %s39_s27 }
   0x4   :  { %s41_s29 = sshll.u32 %s1366_s28, 4  ;;  %s26_s15 = sshll.u32 %s1856_s0, 4  ;;  %s42_s29 = int_to_ptr.vmem [resolvable:$true] %s41_s29  ;;  %s27_s15 = int_to_ptr.hbm [resolvable:$true] %s26_s15 }
   0x5   :  { %s1367_s16 = smov 128   ;;  %s1368_s17 = smov 8  }
   0x6   :  { %47 = dma.hbm_to_vmem [thread:$0]  %s40_s27, 1024, %s42_s29, [#allocation6], %s1367_s16, %s1367_s16, %s1368_s17  }
   0x7   :  { %s1369_s18 = smov [#allocation2]   ;;  %s66_s1 = sshll.u32 %s1865_s9, 4  ;;  %s67_s1 = int_to_ptr.hbm [resolvable:$true] %s66_s1 }
   0x8   :  { %s28_s19 = sshll.u32 %s1369_s18, 4  ;;  %s1370_s0 = smov [#allocation7]   ;;  %s29_s19 = int_to_ptr.vmem [resolvable:$true] %s28_s19 }
   0x9   :  { %34 = dma.hbm_to_vmem [thread:$0]  %s27_s15, 1024, %s29_s19, [#allocation3], %s1367_s16, %s1367_s16, %s1368_s17  }
   0xa   :  { %s68_s22 = sshll.u32 %s1370_s0, 4  ;;  %s81_s25 = sshll.u32 %s1867_s11, 4  ;;  %s69_s22 = int_to_ptr.vmem [resolvable:$true] %s68_s22  ;;  %s82_s25 = int_to_ptr.hbm [resolvable:$true] %s81_s25 }
   0xb   :  { %s1371_s26 = smov 64   ;;  %s1372_s27 = smov 4  }
   0xc   :  { %74 = dma.hbm_to_vmem [thread:$0]  %s67_s1, 256, %s69_s22, [#allocation6], %s1371_s26, %s1371_s26, %s1372_s27  }
   0xd   :  { %s1373_s28 = smov [#allocation8]  }
   0xe   :  { %s83_s29 = sshll.u32 %s1373_s28, 4  ;;  %s84_s29 = int_to_ptr.vmem [resolvable:$true] %s83_s29 }
   0xf   :  { %89 = dma.hbm_to_vmem [thread:$0]  %s82_s25, 256, %s84_s29, [#allocation9], %s1371_s26, %s1371_s26, %s1372_s27  }
  0x10   :  { %1358 = dma.done.wait [#allocation3], 1024  }
  0x11   :  { %1359 = vsyncadd [#allocation3], 4294966272 }
  0x12   :  { %1360 = dma.done.wait [#allocation6], 1280  }
  0x13   :  { %1361 = vsyncadd [#allocation6], 4294966016 }
  0x14   :  { %1362 = dma.done.wait [#allocation9], 256  }
  0x15   :  { %1363 = vsyncadd [#allocation9], 4294967040  ;;  %v1139_v0 = vld [vmem:[%s1859_s3 + $0x8] sm:$0xff]  ;;  %v1138_v1 = vld [vmem:[%s1859_s3] sm:$0xff]  ;;  %vm240_vm0 = vcmask 261120   ;;  %s1374_s3 = smov 24  }
  0x16   :  { %v111_v2 = vld [vmem:[#allocation2 + $0x10] sm:$0xff]  ;;  %1167 = vmatpush.bf16.msra.mxu3 %v1139_v0  ;;  %v112_v3 = vld [vmem:[#allocation2 + $0x18] sm:$0xff]  ;;  %v117_v4 = vld [vmem:[#allocation5] sm:$0xff]  ;;  %354 = vmatpush.bf16.msra.mxu0 %v1139_v0  ;;  %s1375_s15 = smov 40   ;;  %s1376_s18 = smov 16   ;;  %vm209_vm1 = vcmask 64512  }
  0x17   :  { %v118_v5 = vld [vmem:[#allocation5 + $0x8] sm:$0xff]  ;;  %v125_v6 = vpack.c.bf16 %v117_v4, %v117_v4  ;;  %v317_v8 = vpack.c.bf16 %v112_v3, %v111_v2  ;;  %v1482_v12 = vld [vmem:[#allocation2] sm:$0xff]  ;;  %v119_v14 = vld [vmem:[#allocation5 + $0x10] sm:$0xff]  ;;  %s1377_s19 = smov 32   ;;  %s1378_s20 = smov 48   ;;  %vm222_vm2 = vcmask 130048  }
  0x18   :  { %v126_v7 = vpack.c.bf16 %v118_v5, %v118_v5  ;;  %v1486_v13 = vld [vmem:[#allocation2 + $0x8] sm:$0xff]  ;;  %v120_v15 = vld [vmem:[#allocation5 + $0x18] sm:$0xff]  ;;  %v127_v17 = vpack.c.bf16 %v119_v14, %v119_v14  ;;  %v113_v19 = vld [vmem:[#allocation2 + $0x20] sm:$0xff]  ;;  %s1379_s21 = smov 56   ;;  %vm231_vm3 = vcmask 195584   ;;  %vm249_vm4 = vcmask 326656  }
  0x19   :  { %v141_v9 = vunpack.c.l.b16 %v125_v6  ;;  %v316_v16 = vpack.c.bf16 %v1486_v13, %v1482_v12  ;;  %v128_v18 = vpack.c.bf16 %v120_v15, %v120_v15  ;;  %v114_v20 = vld [vmem:[#allocation2 + $0x28] sm:$0xff]  ;;  %v121_v25 = vld [vmem:[#allocation5 + $0x20] sm:$0xff]  ;;  %v115_v29 = vld [vmem:[#allocation2 + $0x30] sm:$0xff]  ;;  %vm258_vm5 = vcmask 392192   ;;  %s1059_s24 = sshll.u32 %s1869_s13, 4  ;;  %s1060_s24 = int_to_ptr.hbm [resolvable:$true] %s1059_s24 }
  0x1a   :  { %v142_v10 = vunpack.c.l.b16 %v126_v7  ;;  %1168 = vmatpush.bf16.msra.mxu3 %v1138_v1  ;;  %355 = vmatpush.bf16.msra.mxu0 %v1138_v1  ;;  %v143_v21 = vunpack.c.l.b16 %v127_v17  ;;  %v318_v23 = vpack.c.bf16 %v114_v20, %v113_v19  ;;  %v122_v26 = vld [vmem:[#allocation5 + $0x28] sm:$0xff]  ;;  %v129_v27 = vpack.c.bf16 %v121_v25, %v121_v25  ;;  %v116_v30 = vld [vmem:[#allocation2 + $0x38] sm:$0xff]  ;;  %v123_v35 = vld [vmem:[#allocation5 + $0x30] sm:$0xff] }
  0x1b   :  { %v144_v22 = vunpack.c.l.b16 %v128_v18  ;;  %v130_v28 = vpack.c.bf16 %v122_v26, %v122_v26  ;;  %v319_v33 = vpack.c.bf16 %v116_v30, %v115_v29  ;;  %v124_v36 = vld [vmem:[#allocation5 + $0x38] sm:$0xff]  ;;  %v131_v37 = vpack.c.bf16 %v123_v35, %v123_v35  ;;  %v1165_v26 = vld [vmem:[%s1858_s2 + $0x10] sm:$0xff]   ;;  %v1149_v30 = vld [vmem:[%s1858_s2] sm:$0xff]  }
  0x1c   :  { %v1477_v11 = vpack.c.b16 %v142_v10, %v141_v9  ;;  %v145_v31 = vunpack.c.l.b16 %v129_v27  ;;  %v132_v38 = vpack.c.bf16 %v124_v36, %v124_v36  ;;  %vm267_vm6 = vcmask 457728  }
  0x1d   :  { %1083 = vmatmul.msk.bf16.vlgmr.msra.gmra.mxu3 %vm240_vm0, %v317_v8  ;;  %1082 = vmatmul.msk.bf16.vlgmr.msra.gmra.mxu0 %vm240_vm0, %v316_v16  ;;  %v1499_v24 = vpack.c.b16 %v144_v22, %v143_v21  ;;  %v146_v32 = vunpack.c.l.b16 %v130_v28  ;;  %v147_v39 = vunpack.c.l.b16 %v131_v37  ;;  %vm385_vm7 = vcmask 523264  }
  0x1e   :  { %153 = vrot.lane.b32.xlu0 %v1477_v11, %s1368_s17  ;;  %169 = vrot.lane.b32.xlu1 %v1477_v11, %s1374_s3  ;;  %v148_v40 = vunpack.c.l.b16 %v132_v38 }
  0x1f   :  { %185 = vrot.lane.b32.xlu2 %v1477_v11, %s1375_s15  ;;  %v151_v34 = vpack.c.b16 %v146_v32, %v145_v31 }
  0x20   :  { %v152_v41 = vpack.c.b16 %v148_v40, %v147_v39  ;;  %v1150_v39 = vunpack.c.l.bf16 %v1149_v30  ;;  %v1151_v40 = vunpack.c.h.bf16 %v1149_v30 }
  0x26   :  { %161 = vrot.lane.b32.xlu0 %v1477_v11, %s1376_s18  ;;  %177 = vrot.lane.b32.xlu1 %v1477_v11, %s1377_s19 }
  0x27   :  { %193 = vrot.lane.b32.xlu2 %v1477_v11, %s1378_s20 }
  0x2d   :  { %1084 = vmatmul.msk.bf16.gmra.mxu3 %vm240_vm0, %v318_v23 }
  0x2e   :  { %201 = vrot.lane.b32.xlu0 %v1477_v11, %s1379_s21  ;;  %155 = vrot.lane.b32.xlu1 %v1499_v24, %s1368_s17 }
  0x2f   :  { %163 = vrot.lane.b32.xlu2 %v1499_v24, %s1376_s18 }
  0x36   :  { %171 = vrot.lane.b32.xlu0 %v1499_v24, %s1374_s3  ;;  %179 = vrot.lane.b32.xlu1 %v1499_v24, %s1377_s19 }
  0x37   :  { %187 = vrot.lane.b32.xlu2 %v1499_v24, %s1375_s15 }
  0x3d   :  { %1085 = vmatmul.msk.bf16.gmra.mxu3 %vm240_vm0, %v319_v33  ;;  %v1158_v33 = vunpack.c.l.bf16 %v1165_v26 }
  0x3e   :  { %195 = vrot.lane.b32.xlu0 %v1499_v24, %s1378_s20  ;;  %203 = vrot.lane.b32.xlu1 %v1499_v24, %s1379_s21 }
  0x3f   :  { %157 = vrot.lane.b32.xlu2 %v151_v34, %s1368_s17 }
  0x46   :  { %165 = vrot.lane.b32.xlu0 %v151_v34, %s1376_s18  ;;  %173 = vrot.lane.b32.xlu1 %v151_v34, %s1374_s3 }
  0x47   :  { %181 = vrot.lane.b32.xlu2 %v151_v34, %s1377_s19 }
  0x4e   :  { %189 = vrot.lane.b32.xlu0 %v151_v34, %s1375_s15  ;;  %197 = vrot.lane.b32.xlu1 %v151_v34, %s1378_s20 }
  0x4f   :  { %205 = vrot.lane.b32.xlu2 %v151_v34, %s1379_s21 }
  0x56   :  { %159 = vrot.lane.b32.xlu0 %v152_v41, %s1368_s17  ;;  %167 = vrot.lane.b32.xlu1 %v152_v41, %s1376_s18 }
  0x57   :  { %175 = vrot.lane.b32.xlu2 %v152_v41, %s1374_s3 }
  0x5e   :  { %183 = vrot.lane.b32.xlu0 %v152_v41, %s1377_s19  ;;  %191 = vrot.lane.b32.xlu1 %v152_v41, %s1375_s15 }
  0x5f   :  { %199 = vrot.lane.b32.xlu2 %v152_v41, %s1378_s20 }
  0x66   :  { %207 = vrot.lane.b32.xlu0 %v152_v41, %s1379_s21 }
  0x79   :  { %v186_v42 = vpop.permute.xlu2 %185 }
  0x81   :  { %v194_v45 = vpop.permute.xlu2 %193 }
  0x89   :  { %v164_v48 = vpop.permute.xlu2 %163 }
  0x90   :  { %v154_v43 = vpop.permute.xlu0 %153  ;;  %v170_v44 = vpop.permute.xlu1 %169 }
  0x91   :  { %v1535_v52 = vpop.permute.xlu2 %187  ;;  %v212_v1 = vsel %vm209_vm1, %v1477_v11, %v154_v43 }
  0x98   :  { %v162_v46 = vpop.permute.xlu0 %161  ;;  %v178_v47 = vpop.permute.xlu1 %177 }
  0x99   :  { %v158_v56 = vpop.permute.xlu2 %157  ;;  %v224_v3 = vsel %vm222_vm2, %v212_v1, %v162_v46 }
  0x9a   :  { %v218_v0 = vsel %vm209_vm1, %v151_v34, %v158_v56  ;;  %v233_v8 = vsel %vm231_vm3, %v224_v3, %v170_v44  ;;  %v357_v16 = vpop.f32.mrf.mxu0  ;;  %v1159_v34 = vunpack.c.h.bf16 %v1165_v26 }
  0x9b   :  { %v242_v14 = vsel %vm240_vm0, %v233_v8, %v178_v47 }
  0x9c   :  { %v251_v15 = vsel %vm249_vm4, %v242_v14, %v186_v42 }
  0x9d   :  { %v260_v23 = vsel %vm258_vm5, %v251_v15, %v194_v45 }
  0xa0   :  { %v202_v49 = vpop.permute.xlu0 %201  ;;  %v1533_v50 = vpop.f32.mrf.mxu3 }
  0xa1   :  { %v156_v51 = vpop.permute.xlu1 %155  ;;  %v182_v61 = vpop.permute.xlu2 %181  ;;  %v269_v31 = vsel %vm267_vm6, %v260_v23, %v202_v49  ;;  %v1190_v23 = vld [vmem:[%s1860_s4] ss:$0 sm:$0xff] }
  0xa2   :  { %v215_v25 = vsel %vm209_vm1, %v1499_v24, %v156_v51  ;;  %v289_v42 = vunpack.c.h.bf16 %v269_v31  ;;  %v359_v45 = vpop.f32.mrf.mxu0 }
  0xa3   :  { %v226_v24 = vsel %vm222_vm2, %v215_v25, %v164_v48 }
  0xa4   :  { %v305_v56 = vmul.f32 %v1151_v40, %v289_v42 }
  0xa8   :  { %v1537_v53 = vpop.permute.xlu0 %171  ;;  %v364_v54 = vpop.f32.mrf.mxu3 }
  0xa9   :  { %v1539_v55 = vpop.permute.xlu1 %179  ;;  %v206_v9 = vpop.permute.xlu2 %205  ;;  %v378_v43 = vpack.c.bf16 %v364_v54, %v1533_v50  ;;  %v235_v44 = vsel %vm231_vm3, %v226_v24, %v1537_v53 }
  0xb0   :  { %v1541_v57 = vpop.permute.xlu0 %195  ;;  %v367_v58 = vpop.f32.mrf.mxu3 }
  0xb1   :  { %v1543_v59 = vpop.permute.xlu1 %203  ;;  %v176_v28 = vpop.permute.xlu2 %175 }
  0xb8   :  { %v166_v60 = vpop.permute.xlu0 %165  ;;  %v369_v62 = vpop.f32.mrf.mxu3 }
  0xb9   :  { %v174_v63 = vpop.permute.xlu1 %173  ;;  %v228_v2 = vsel %vm222_vm2, %v218_v0, %v166_v60  ;;  %v379_v32 = vpack.c.bf16 %v369_v62, %v367_v58  ;;  %v244_v58 = vsel %vm240_vm0, %v235_v44, %v1539_v55  ;;  %v377_v60 = vpack.c.bf16 %v359_v45, %v357_v16  ;;  %v200_v50 = vpop.permute.xlu2 %199 }
  0xba   :  { %v237_v4 = vsel %vm231_vm3, %v228_v2, %v174_v63  ;;  %v253_v53 = vsel %vm249_vm4, %v244_v58, %v1535_v52  ;;  %v1166_v52 = vld [vmem:[%s1858_s2 + $0x18] sm:$0xff]   ;;  %v1164_v2 = vld [vmem:[%s1858_s2 + $0x8] sm:$0xff]  }
  0xbb   :  { %v246_v10 = vsel %vm240_vm0, %v237_v4, %v182_v61  ;;  %v262_v55 = vsel %vm258_vm5, %v253_v53, %v1541_v57  ;;  %v1162_v57 = vunpack.c.l.bf16 %v1166_v52  ;;  %v1163_v4 = vunpack.c.h.bf16 %v1166_v52 }
  0xbc   :  { %v272_v3 = vsel %vm267_vm6, %v262_v55, %v1543_v59  ;;  %v1155_v8 = vunpack.c.h.bf16 %v1164_v2  ;;  %v1143_v59 = vld [vmem:[%s1861_s5 + $0x18] sm:$0xff] }
  0xc0   :  { %v190_v5 = vpop.permute.xlu0 %189  ;;  %v372_v6 = vpop.f32.mrf.mxu3 }
  0xc1   :  { %v198_v7 = vpop.permute.xlu1 %197  ;;  %v255_v11 = vsel %vm249_vm4, %v246_v10, %v190_v5  ;;  %v291_v10 = vunpack.c.h.bf16 %v272_v3 }
  0xc2   :  { %v264_v19 = vsel %vm258_vm5, %v255_v11, %v198_v7  ;;  %v1154_v7 = vunpack.c.l.bf16 %v1164_v2 }
  0xc3   :  { %v275_v27 = vsel %vm267_vm6, %v264_v19, %v206_v9  ;;  %v290_v9 = vunpack.c.l.bf16 %v272_v3  ;;  %v307_v16 = vmul.f32 %v1155_v8, %v291_v10  ;;  %v1142_v19 = vld [vmem:[%s1861_s5 + $0x10] sm:$0xff]  ;;  %v1191_v3 = vld [vmem:[%s1862_s6] ss:$0 sm:$0xff] }
  0xc4   :  { %v292_v35 = vunpack.c.l.bf16 %v275_v27  ;;  %v293_v36 = vunpack.c.h.bf16 %v275_v27 }
  0xc5   :  { %v306_v15 = vmul.f32 %v1154_v7, %v290_v9 }
  0xc6   :  { %v308_v46 = vmul.f32 %v1158_v33, %v292_v35  ;;  %v309_v47 = vmul.f32 %v1159_v34, %v293_v36 }
  0xc8   :  { %v160_v17 = vpop.permute.xlu0 %159  ;;  %v374_v18 = vpop.f32.mrf.mxu3  ;;  %v1579_v54 = vpack.c.bf16 %v309_v47, %v308_v46 }
  0xc9   :  { %v168_v20 = vpop.permute.xlu1 %167  ;;  %v380_v21 = vpack.c.bf16 %v374_v18, %v372_v6  ;;  %v221_v22 = vsel %vm209_vm1, %v152_v41, %v160_v17  ;;  %v288_v41 = vunpack.c.l.bf16 %v269_v31  ;;  %v313_v18 = vpack.c.bf16 %v307_v16, %v306_v15 }
  0xca   :  { %v230_v29 = vsel %vm222_vm2, %v221_v22, %v168_v20  ;;  %v1141_v20 = vld [vmem:[%s1861_s5 + $0x8] sm:$0xff] }
  0xcb   :  { %402 = vmatpush.bf16.msra.mxu1 %v380_v21  ;;  %1169 = vmatpush.bf16.msra.mxu2 %v380_v21  ;;  %v239_v37 = vsel %vm231_vm3, %v230_v29, %v176_v28  ;;  %v304_v51 = vmul.f32 %v1150_v39, %v288_v41  ;;  %v1140_v21 = vld [vmem:[%s1861_s5] sm:$0xff] }
  0xcd   :  { %v1583_v62 = vpack.c.bf16 %v305_v56, %v304_v51 }
  0xcf   :  { %403 = vmatpush.bf16.msra.mxu1 %v379_v32  ;;  %1170 = vmatpush.bf16.msra.mxu2 %v379_v32 }
  0xd0   :  { %v184_v38 = vpop.permute.xlu0 %183 }
  0xd1   :  { %v248_v48 = vsel %vm240_vm0, %v239_v37, %v184_v38  ;;  %v192_v49 = vpop.permute.xlu1 %191 }
  0xd2   :  { %v257_v61 = vsel %vm249_vm4, %v248_v48, %v192_v49 }
  0xd3   :  { %404 = vmatpush.bf16.msra.mxu1 %v378_v43  ;;  %1171 = vmatpush.bf16.msra.mxu2 %v378_v43  ;;  %v266_v63 = vsel %vm258_vm5, %v257_v61, %v200_v50 }
  0xd7   :  { %405 = vmatpush.bf16.msra.mxu1 %v377_v60  ;;  %1172 = vmatpush.bf16.msra.mxu2 %v377_v60 }
  0xd8   :  { %v208_v0 = vpop.permute.xlu0 %207 }
  0xd9   :  { %v278_v1 = vsel %vm267_vm6, %v266_v63, %v208_v0 }
  0xda   :  { %1086 = vmatmul.msk.bf16.vlgmr.msra.gmra.mxu1 %vm385_vm7, %v1583_v62  ;;  %1088 = vmatmul.msk.bf16.vlgmr.msra.gmra.mxu2 %vm385_vm7, %v1579_v54  ;;  %v294_v5 = vunpack.c.l.bf16 %v278_v1  ;;  %v295_v6 = vunpack.c.h.bf16 %v278_v1 }
  0xdb   :  { %487 = vmatpush.bf16.msrb.mxu2 %v1143_v59 }
  0xdc   :  { %v310_v14 = vmul.f32 %v1162_v57, %v294_v5  ;;  %v311_v11 = vmul.f32 %v1163_v4, %v295_v6 }
  0xde   :  { %v1601_v17 = vpack.c.bf16 %v311_v11, %v310_v14 }
  0xdf   :  { %488 = vmatpush.bf16.msrb.mxu2 %v1142_v19 }
  0xe3   :  { %489 = vmatpush.bf16.msrb.mxu2 %v1141_v20 }
  0xe7   :  { %490 = vmatpush.bf16.msrb.mxu2 %v1140_v21 }
  0xea   :  { %1087 = vmatmul.msk.bf16.gmra.mxu1 %vm385_vm7, %v313_v18  ;;  %1089 = vmatmul.msk.bf16.gmra.mxu2 %vm385_vm7, %v1601_v17 }
 0x157   :  { %v407_v22 = vpop.f32.mrf.mxu1 }
 0x158   :  { %v408_v25 = vadd.f32 %v1190_v23, %v407_v22 }
 0x15a   :  { %v427_v28 = vmax.f32 %v408_v25, 0.0 }
 0x15d   :  { %v417_v32 = vpop.f32.mrf.mxu2 }
 0x15e   :  { %v418_v39 = vadd.f32 %v1190_v23, %v417_v32 }
 0x15f   :  { %v409_v26 = vpop.f32.mrf.mxu1 }
 0x160   :  { %v410_v27 = vadd.f32 %v1190_v23, %v409_v26  ;;  %v431_v42 = vmax.f32 %v418_v39, 0.0 }
 0x162   :  { %v428_v29 = vmax.f32 %v410_v27, 0.0 }
 0x164   :  { %v435_v30 = vpack.c.bf16 %v428_v29, %v427_v28 }
 0x165   :  { %v419_v38 = vpop.f32.mrf.mxu2 }
 0x166   :  { %1106 = vmatmul.msk.bf16.vlgmr.msrb.gmra.mxu2 %vm385_vm7, %v435_v30  ;;  %v420_v40 = vadd.f32 %v1190_v23, %v419_v38 }
 0x167   :  { %v412_v31 = vpop.f32.mrf.mxu1 }
 0x168   :  { %v413_v24 = vadd.f32 %v1190_v23, %v412_v31  ;;  %v432_v43 = vmax.f32 %v420_v40, 0.0 }
 0x16a   :  { %v429_v35 = vmax.f32 %v413_v24, 0.0  ;;  %v437_v44 = vpack.c.bf16 %v432_v43, %v431_v42 }
 0x16d   :  { %v422_v41 = vpop.f32.mrf.mxu2 }
 0x16e   :  { %v423_v46 = vadd.f32 %v1190_v23, %v422_v41 }
 0x16f   :  { %v414_v33 = vpop.f32.mrf.mxu1 }
 0x170   :  { %v415_v34 = vadd.f32 %v1190_v23, %v414_v33  ;;  %v433_v48 = vmax.f32 %v423_v46, 0.0 }
 0x172   :  { %v430_v36 = vmax.f32 %v415_v34, 0.0 }
 0x174   :  { %v436_v37 = vpack.c.bf16 %v430_v36, %v429_v35 }
 0x175   :  { %v424_v45 = vpop.f32.mrf.mxu2 }
 0x176   :  { %1107 = vmatmul.msk.bf16.gmra.mxu2 %vm385_vm7, %v436_v37  ;;  %v425_v47 = vadd.f32 %v1190_v23, %v424_v45  ;;  %v1380_v23 = vmov 32.0  }
 0x177   :  { %1196 = vrcp.f32 %v1380_v23 }
 0x178   :  { %v434_v49 = vmax.f32 %v425_v47, 0.0 }
 0x17a   :  { %v438_v51 = vpack.c.bf16 %v434_v49, %v433_v48 }
 0x17d   :  { %v1197_v25 = vpop.eup %1196 }
 0x17e   :  { %v574_v26 = vmul.f32 32.0, %v1197_v25  ;;  %vm578_vm8 = vweird.f32 %v1197_v25 }
 0x180   :  { %v575_v27 = vsub.f32 1.0, %v574_v26 }
 0x182   :  { %v576_v28 = vmul.f32 %v1197_v25, %v575_v27 }
 0x184   :  { %v577_v29 = vadd.f32 %v1197_v25, %v576_v28 }
 0x186   :  { %1108 = vmatmul.msk.bf16.gmra.mxu2 %vm385_vm7, %v437_v44  ;;  %v579_v30 = vsel %vm578_vm8, %v1197_v25, %v577_v29 }
 0x196   :  { %1109 = vmatmul.msk.bf16.gmra.mxu2 %vm385_vm7, %v438_v51 }
 0x1e9   :  { %v492_v56 = vpop.f32.mrf.mxu2 }
 0x1f1   :  { %v494_v58 = vpop.f32.mrf.mxu2 }
 0x1f2   :  { %v512_v2 = vpack.c.bf16 %v494_v58, %v492_v56 }
 0x1f9   :  { %v497_v60 = vpop.f32.mrf.mxu2 }
 0x201   :  { %v499_v61 = vpop.f32.mrf.mxu2 }
 0x202   :  { %v513_v1 = vpack.c.bf16 %v499_v61, %v497_v60 }
 0x209   :  { %v502_v50 = vpop.f32.mrf.mxu2 }
 0x211   :  { %v504_v53 = vpop.f32.mrf.mxu2 }
 0x212   :  { %v514_v52 = vpack.c.bf16 %v504_v53, %v502_v50 }
 0x219   :  { %v507_v63 = vpop.f32.mrf.mxu2 }
 0x221   :  { %v509_v0 = vpop.f32.mrf.mxu2 }
 0x222   :  { %v515_v55 = vpack.c.bf16 %v509_v0, %v507_v63 }
 0x224   :  { %524 = vmatpush.bf16.msrb.mxu3 %v515_v55 }
 0x228   :  { %525 = vmatpush.bf16.msrb.mxu3 %v514_v52 }
 0x22c   :  { %526 = vmatpush.bf16.msrb.mxu3 %v513_v1 }
 0x230   :  { %527 = vmatpush.bf16.msrb.mxu3 %v512_v2 }
 0x233   :  { %1110 = vmatmul.msk.bf16.vlgmr.msrb.gmra.mxu3 %vm385_vm7, %v1583_v62 }
 0x243   :  { %1111 = vmatmul.msk.bf16.gmra.mxu3 %vm385_vm7, %v313_v18 }
 0x253   :  { %1112 = vmatmul.msk.bf16.gmra.mxu3 %vm385_vm7, %v1579_v54 }
 0x263   :  { %1113 = vmatmul.msk.bf16.gmra.mxu3 %vm385_vm7, %v1601_v17 }
 0x2b6   :  { %v529_v57 = vpop.f32.mrf.mxu3 }
 0x2b7   :  { %v530_v4 = vadd.f32 %v1191_v3, %v529_v57 }
 0x2b9   :  { %v549_v5 = vsel %vm240_vm0, %v530_v4, 0.0 }
 0x2ba   :  { %550 = vadd.xlane.f32.xlu1 %v549_v5 }
 0x2be   :  { %v531_v6 = vpop.f32.mrf.mxu3 }
 0x2bf   :  { %v532_v7 = vadd.f32 %v1191_v3, %v531_v6 }
 0x2c1   :  { %v552_v62 = vsel %vm240_vm0, %v532_v7, 0.0 }
 0x2c2   :  { %553 = vadd.xlane.f32.xlu2 %v552_v62 }
 0x2c6   :  { %v534_v8 = vpop.f32.mrf.mxu3 }
 0x2c7   :  { %v535_v9 = vadd.f32 %v1191_v3, %v534_v8 }
 0x2c9   :  { %v555_v54 = vsel %vm240_vm0, %v535_v9, 0.0 }
 0x2ca   :  { %556 = vadd.xlane.f32.xlu0 %v555_v54 }
 0x2ce   :  { %v536_v10 = vpop.f32.mrf.mxu3 }
 0x2cf   :  { %v537_v14 = vadd.f32 %v1191_v3, %v536_v10 }
 0x2d1   :  { %v558_v11 = vsel %vm240_vm0, %v537_v14, 0.0 }
 0x2d2   :  { %559 = vadd.xlane.f32.xlu2 %v558_v11 }
 0x2d6   :  { %v539_v15 = vpop.f32.mrf.mxu3 }
 0x2d7   :  { %v540_v16 = vadd.f32 %v1191_v3, %v539_v15 }
 0x2d9   :  { %v561_v17 = vsel %vm240_vm0, %v540_v16, 0.0 }
 0x2da   :  { %562 = vadd.xlane.f32.xlu1 %v561_v17 }
 0x2de   :  { %v541_v18 = vpop.f32.mrf.mxu3 }
 0x2df   :  { %v542_v59 = vadd.f32 %v1191_v3, %v541_v18 }
 0x2e1   :  { %v564_v19 = vsel %vm240_vm0, %v542_v59, 0.0 }
 0x2e2   :  { %565 = vadd.xlane.f32.xlu2 %v564_v19 }
 0x2e6   :  { %v544_v20 = vpop.f32.mrf.mxu3 }
 0x2e7   :  { %v545_v21 = vadd.f32 %v1191_v3, %v544_v20 }
 0x2e9   :  { %v567_v22 = vsel %vm240_vm0, %v545_v21, 0.0 }
 0x2ea   :  { %568 = vadd.xlane.f32.xlu2 %v567_v22 }
 0x2ee   :  { %v546_v35 = vpop.f32.mrf.mxu3 }
 0x2ef   :  { %v547_v38 = vadd.f32 %v1191_v3, %v546_v35 }
 0x2f1   :  { %v570_v42 = vsel %vm240_vm0, %v547_v38, 0.0 }
 0x32d   :  { %v551_v31 = vpop.xlane.xlu1 %550 }
 0x32e   :  { %v580_v32 = vmul.f32 %v579_v30, %v551_v31 }
 0x330   :  { %v1642_v24 = vsub.f32 %v530_v4, %v580_v32 }
 0x332   :  { %v596_v33 = vmul.f32 %v1642_v24, %v1642_v24 }
 0x334   :  { %v604_v34 = vsel %vm240_vm0, %v596_v33, 0.0  ;;  %v1145_v33 = vld [vmem:[#allocation7 + $0x8] sm:$0xff] }
 0x335   :  { %v554_v36 = vpop.xlane.xlu2 %553  ;;  %605 = vadd.xlane.f32.xlu0 %v604_v34  ;;  %941 = vmatpush.bf16.msrb.mxu0 %v1145_v33 }
 0x336   :  { %v581_v37 = vmul.f32 %v579_v30, %v554_v36 }
 0x338   :  { %v1647_v39 = vsub.f32 %v532_v7, %v581_v37  ;;  %v1381_v7 = vmov 31.0  }
 0x339   :  { %1198 = vrcp.f32 %v1381_v7 }
 0x33a   :  { %v597_v40 = vmul.f32 %v1647_v39, %v1647_v39 }
 0x33c   :  { %v607_v41 = vsel %vm240_vm0, %v597_v40, 0.0 }
 0x33d   :  { %v557_v43 = vpop.xlane.xlu0 %556  ;;  %608 = vadd.xlane.f32.xlu1 %v607_v41  ;;  %571 = vadd.xlane.f32.xlu0 %v570_v42  ;;  %v1144_v41 = vld [vmem:[#allocation7] sm:$0xff] }
 0x33e   :  { %v582_v44 = vmul.f32 %v579_v30, %v557_v43  ;;  %942 = vmatpush.bf16.msrb.mxu0 %v1144_v41 }
 0x33f   :  { %v1199_v62 = vpop.eup %1198 }
 0x340   :  { %v1653_v45 = vsub.f32 %v535_v9, %v582_v44  ;;  %v629_v8 = vmul.f32 31.0, %v1199_v62  ;;  %vm633_vm9 = vweird.f32 %v1199_v62 }
 0x342   :  { %v598_v46 = vmul.f32 %v1653_v45, %v1653_v45  ;;  %v630_v9 = vsub.f32 1.0, %v629_v8 }
 0x344   :  { %v610_v47 = vsel %vm240_vm0, %v598_v46, 0.0  ;;  %v631_v54 = vmul.f32 %v1199_v62, %v630_v9 }
 0x345   :  { %v560_v48 = vpop.xlane.xlu2 %559  ;;  %611 = vadd.xlane.f32.xlu1 %v610_v47 }
 0x346   :  { %v583_v49 = vmul.f32 %v579_v30, %v560_v48  ;;  %v632_v10 = vadd.f32 %v1199_v62, %v631_v54 }
 0x348   :  { %v1658_v51 = vsub.f32 %v537_v14, %v583_v49  ;;  %v1678_v14 = vsel %vm633_vm9, %v1199_v62, %v632_v10 }
 0x34a   :  { %v599_v56 = vmul.f32 %v1658_v51, %v1658_v51 }
 0x34c   :  { %v613_v58 = vsel %vm240_vm0, %v599_v56, 0.0 }
 0x34d   :  { %614 = vadd.xlane.f32.xlu2 %v613_v58  ;;  %v563_v60 = vpop.xlane.xlu1 %562 }
 0x34e   :  { %v584_v61 = vmul.f32 %v579_v30, %v563_v60 }
 0x350   :  { %v1663_v50 = vsub.f32 %v540_v16, %v584_v61 }
 0x352   :  { %v600_v53 = vmul.f32 %v1663_v50, %v1663_v50 }
 0x354   :  { %v616_v63 = vsel %vm240_vm0, %v600_v53, 0.0 }
 0x355   :  { %v566_v0 = vpop.xlane.xlu2 %565  ;;  %617 = vadd.xlane.f32.xlu0 %v616_v63 }
 0x356   :  { %v585_v55 = vmul.f32 %v579_v30, %v566_v0 }
 0x358   :  { %v1668_v52 = vsub.f32 %v542_v59, %v585_v55 }
 0x35a   :  { %v601_v1 = vmul.f32 %v1668_v52, %v1668_v52 }
 0x35c   :  { %v619_v2 = vsel %vm240_vm0, %v601_v1, 0.0 }
 0x35d   :  { %v569_v3 = vpop.xlane.xlu2 %568  ;;  %620 = vadd.xlane.f32.xlu1 %v619_v2 }
 0x35e   :  { %v586_v57 = vmul.f32 %v579_v30, %v569_v3 }
 0x360   :  { %v1673_v4 = vsub.f32 %v545_v21, %v586_v57 }
 0x362   :  { %v602_v5 = vmul.f32 %v1673_v4, %v1673_v4 }
 0x364   :  { %v622_v6 = vsel %vm240_vm0, %v602_v5, 0.0 }
 0x365   :  { %623 = vadd.xlane.f32.xlu2 %v622_v6 }
 0x3a8   :  { %v606_v11 = vpop.xlane.xlu0 %605 }
 0x3a9   :  { %v635_v15 = vmul.f32 %v1678_v14, %v606_v11 }
 0x3ab   :  { %1200 = vrsqrt.f32 %v635_v15  ;;  %vm662_vm10 = vcmp.eq.f32.partialorder %v635_v15, inf  ;;  %v665_v36 = vand.u32 2147483648, %v635_v15  ;;  %vm664_vm11 = vcmp.eq.f32.partialorder %v635_v15, 0.0 }
 0x3b0   :  { %v572_v16 = vpop.xlane.xlu0 %571  ;;  %v609_v17 = vpop.xlane.xlu1 %608 }
 0x3b1   :  { %v1201_v18 = vpop.eup %1200  ;;  %v587_v59 = vmul.f32 %v579_v30, %v572_v16  ;;  %v636_v19 = vmul.f32 %v1678_v14, %v609_v17 }
 0x3b2   :  { %v656_v20 = vmul.f32 %v1201_v18, %v635_v15 }
 0x3b3   :  { %v1682_v21 = vsub.f32 %v547_v38, %v587_v59  ;;  %1202 = vrsqrt.f32 %v636_v19  ;;  %vm674_vm12 = vcmp.eq.f32.partialorder %v636_v19, inf  ;;  %v677_v60 = vand.u32 2147483648, %v636_v19 }
 0x3b4   :  { %v657_v22 = vmul.f32 %v1201_v18, %v656_v20  ;;  %vm676_vm13 = vcmp.eq.f32.partialorder %v636_v19, 0.0 }
 0x3b5   :  { %v603_v23 = vmul.f32 %v1682_v21, %v1682_v21 }
 0x3b6   :  { %v658_v25 = vmul.f32 0.5, %v657_v22 }
 0x3b7   :  { %v625_v26 = vsel %vm240_vm0, %v603_v23, 0.0 }
 0x3b8   :  { %v659_v27 = vsub.f32 1.5, %v658_v25  ;;  %626 = vadd.xlane.f32.xlu0 %v625_v26  ;;  %v612_v28 = vpop.xlane.xlu1 %611 }
 0x3b9   :  { %v1203_v29 = vpop.eup %1202  ;;  %v637_v31 = vmul.f32 %v1678_v14, %v612_v28 }
 0x3ba   :  { %v660_v30 = vmul.f32 %v1201_v18, %v659_v27  ;;  %v668_v32 = vmul.f32 %v1203_v29, %v636_v19 }
 0x3bb   :  { %1204 = vrsqrt.f32 %v637_v31  ;;  %vm686_vm14 = vcmp.eq.f32.partialorder %v637_v31, inf  ;;  %v689_v54 = vand.u32 2147483648, %v637_v31  ;;  %vm688_vm15 = vcmp.eq.f32.partialorder %v637_v31, 0.0 }
 0x3bc   :  { %v661_v34 = vmul.f32 %v660_v30, %v635_v15  ;;  %v669_v35 = vmul.f32 %v1203_v29, %v668_v32  ;;  %v1723_v30 = vld [vmem:[%s1863_s7] ss:$0 sm:$0xff] }
 0x3be   :  { %v663_v37 = vsel %vm662_vm10, %v635_v15, %v661_v34  ;;  %v670_v38 = vmul.f32 0.5, %v669_v35 }
 0x3bf   :  { %v666_v40 = vsel %vm664_vm11, %v665_v36, %v663_v37 }
 0x3c0   :  { %v1688_v42 = vadd.f32 1e-06, %v666_v40  ;;  %v671_v43 = vsub.f32 1.5, %v670_v38  ;;  %v615_v44 = vpop.xlane.xlu2 %614 }
 0x3c1   :  { %v1205_v46 = vpop.eup %1204  ;;  %v1691_v47 = vmul.f32 %v1678_v14, %v615_v44  ;;  %v647_v44 = vmul.f32 %v1723_v30, %v1642_v24  ;;  %v1746_v24 = vld [vmem:[%s1864_s8] ss:$0 sm:$0xff] }
 0x3c2   :  { %1206 = vrcp.f32 %v1688_v42  ;;  %v672_v48 = vmul.f32 %v1203_v29, %v671_v43  ;;  %v680_v49 = vmul.f32 %v1205_v46, %v637_v31  ;;  %v770_v20 = vand.u32 2147483648, %v1688_v42 }
 0x3c3   :  { %1208 = vrsqrt.f32 %v1691_v47  ;;  %vm764_vm2 = vweird.f32 %v1688_v42  ;;  %v768_v26 = vand.u32 2147483647, %v1688_v42  ;;  %vm698_vm4 = vcmp.eq.f32.partialorder %v1691_v47, inf }
 0x3c4   :  { %v673_v56 = vmul.f32 %v672_v48, %v636_v19  ;;  %v681_v58 = vmul.f32 %v1205_v46, %v680_v49  ;;  %vm700_vm5 = vcmp.eq.f32.partialorder %v1691_v47, 0.0  ;;  %v771_v35 = vor.u32 1.1754944e-38, %v770_v20 }
 0x3c5   :  { %v701_v37 = vand.u32 2147483648, %v1691_v47  ;;  %vm769_vm6 = vcmp.eq.f32.partialorder %v768_v26, 8.507059e+37 }
 0x3c6   :  { %v675_v61 = vsel %vm674_vm12, %v636_v19, %v673_v56  ;;  %v682_v53 = vmul.f32 0.5, %v681_v58 }
 0x3c7   :  { %v678_v63 = vsel %vm676_vm13, %v677_v60, %v675_v61 }
 0x3c8   :  { %v1207_v0 = vpop.eup %1206  ;;  %v1695_v55 = vadd.f32 1e-06, %v678_v63  ;;  %v683_v1 = vsub.f32 1.5, %v682_v53  ;;  %v618_v2 = vpop.xlane.xlu0 %617 }
 0x3c9   :  { %v1209_v3 = vpop.eup %1208  ;;  %v1698_v57 = vmul.f32 %v1678_v14, %v618_v2  ;;  %v760_v5 = vmul.f32 %v1207_v0, %v1688_v42  ;;  %vm765_vm1 = vweird.f32 %v1207_v0 }
 0x3ca   :  { %1210 = vrcp.f32 %v1695_v55  ;;  %v684_v6 = vmul.f32 %v1205_v46, %v683_v1  ;;  %v692_v7 = vmul.f32 %v1209_v3, %v1691_v47  ;;  %vm1715_vm3 = vmor %vm764_vm2, %vm765_vm1  ;;  %v785_v38 = vand.u32 2147483648, %v1695_v55 }
 0x3cb   :  { %1212 = vrsqrt.f32 %v1698_v57  ;;  %v761_v9 = vsub.f32 1.0, %v760_v5  ;;  %v783_v46 = vand.u32 2147483647, %v1695_v55  ;;  %vm779_vm8 = vweird.f32 %v1695_v55 }
 0x3cc   :  { %v685_v62 = vmul.f32 %v684_v6, %v637_v31  ;;  %v693_v8 = vmul.f32 %v1209_v3, %v692_v7  ;;  %v786_v63 = vor.u32 1.1754944e-38, %v785_v38  ;;  %vm710_vm10 = vcmp.eq.f32.partialorder %v1698_v57, inf }
 0x3cd   :  { %v762_v15 = vmul.f32 %v1207_v0, %v761_v9  ;;  %vm712_vm11 = vcmp.eq.f32.partialorder %v1698_v57, 0.0  ;;  %vm784_vm12 = vcmp.eq.f32.partialorder %v783_v46, 8.507059e+37 }
 0x3ce   :  { %v687_v10 = vsel %vm686_vm14, %v637_v31, %v685_v62  ;;  %v694_v11 = vmul.f32 0.5, %v693_v8  ;;  %v713_v62 = vand.u32 2147483648, %v1698_v57 }
 0x3cf   :  { %v690_v16 = vsel %vm688_vm15, %v689_v54, %v687_v10  ;;  %v763_v19 = vadd.f32 %v1207_v0, %v762_v15 }
 0x3d0   :  { %v1211_v17 = vpop.eup %1210  ;;  %v695_v18 = vsub.f32 1.5, %v694_v11  ;;  %v621_v59 = vpop.xlane.xlu1 %620  ;;  %v1705_v22 = vadd.f32 1e-06, %v690_v16 }
 0x3d1   :  { %v1213_v23 = vpop.eup %1212  ;;  %v1708_v25 = vmul.f32 %v1678_v14, %v621_v59  ;;  %v775_v27 = vmul.f32 %v1211_v17, %v1695_v55  ;;  %v767_v32 = vsel %vm1715_vm3, %v1207_v0, %v763_v19  ;;  %vm780_vm7 = vweird.f32 %v1211_v17 }
 0x3d2   :  { %v696_v28 = vmul.f32 %v1209_v3, %v695_v18  ;;  %v704_v29 = vmul.f32 %v1213_v23, %v1698_v57  ;;  %1214 = vrcp.f32 %v1705_v22  ;;  %v772_v42 = vsel %vm769_vm6, %v771_v35, %v767_v32  ;;  %vm781_vm9 = vmor %vm779_vm8, %vm780_vm7 }
 0x3d3   :  { %1216 = vrsqrt.f32 %v1708_v25  ;;  %v776_v36 = vsub.f32 1.0, %v775_v27  ;;  %v773_v53 = vmul.f32 %v772_v42, %v647_v44  ;;  %v648_v55 = vmul.f32 %v1723_v30, %v1647_v39 }
 0x3d4   :  { %v697_v33 = vmul.f32 %v696_v28, %v1691_v47  ;;  %v705_v34 = vmul.f32 %v1213_v23, %v704_v29  ;;  %v800_v54 = vand.u32 2147483648, %v1705_v22  ;;  %v798_v16 = vand.u32 2147483647, %v1705_v22 }
 0x3d5   :  { %v777_v43 = vmul.f32 %v1211_v17, %v776_v36  ;;  %v883_v9 = vadd.f32 %v1746_v24, %v773_v53  ;;  %vm794_vm14 = vweird.f32 %v1705_v22  ;;  %vm722_vm2 = vcmp.eq.f32.partialorder %v1708_v25, inf }
 0x3d6   :  { %v699_v40 = vsel %vm698_vm4, %v1691_v47, %v697_v33  ;;  %v706_v41 = vmul.f32 0.5, %v705_v34  ;;  %v801_v31 = vor.u32 1.1754944e-38, %v800_v54  ;;  %vm799_vm1 = vcmp.eq.f32.partialorder %v798_v16, 8.507059e+37 }
 0x3d7   :  { %v702_v48 = vsel %vm700_vm5, %v701_v37, %v699_v40  ;;  %v778_v58 = vadd.f32 %v1211_v17, %v777_v43  ;;  %v725_v34 = vand.u32 2147483648, %v1708_v25  ;;  %vm724_vm4 = vcmp.eq.f32.partialorder %v1708_v25, 0.0 }
 0x3d8   :  { %v1215_v49 = vpop.eup %1214  ;;  %v707_v56 = vsub.f32 1.5, %v706_v41  ;;  %v1740_v60 = vadd.f32 1e-06, %v702_v48  ;;  %v650_v44 = vmul.f32 %v1723_v30, %v1658_v51  ;;  %v651_v54 = vmul.f32 %v1723_v30, %v1663_v50 }
 0x3d9   :  { %v1217_v61 = vpop.eup %1216  ;;  %v790_v47 = vmul.f32 %v1215_v49, %v1705_v22  ;;  %v782_v2 = vsel %vm781_vm9, %v1211_v17, %v778_v58  ;;  %vm795_vm13 = vweird.f32 %v1215_v49 }
 0x3da   :  { %v708_v0 = vmul.f32 %v1213_v23, %v707_v56  ;;  %v716_v1 = vmul.f32 %v1217_v61, %v1708_v25  ;;  %1218 = vrcp.f32 %v1740_v60  ;;  %v787_v6 = vsel %vm784_vm12, %v786_v63, %v782_v2  ;;  %vm796_vm15 = vmor %vm794_vm14, %vm795_vm13  ;;  %v1232_v63 = vld [vmem:[#allocation2 + $0x10] sm:$0xff] }
 0x3db   :  { %v791_v7 = vsub.f32 1.0, %v790_v47  ;;  %v788_v8 = vmul.f32 %v787_v6, %v648_v55  ;;  %v1766_v23 = vadd.f32 %v883_v9, %v1482_v12  ;;  %v815_v33 = vand.u32 2147483648, %v1740_v60 }
 0x3dc   :  { %v709_v3 = vmul.f32 %v708_v0, %v1698_v57  ;;  %v717_v5 = vmul.f32 %v1217_v61, %v716_v1  ;;  %vm809_vm5 = vweird.f32 %v1740_v60  ;;  %v1233_v0 = vld [vmem:[#allocation2 + $0x18] sm:$0xff] }
 0x3dd   :  { %v792_v11 = vmul.f32 %v1215_v49, %v791_v7  ;;  %v884_v15 = vadd.f32 %v1746_v24, %v788_v8  ;;  %v816_v42 = vor.u32 1.1754944e-38, %v815_v33 }
 0x3de   :  { %v711_v10 = vsel %vm710_vm10, %v1698_v57, %v709_v3  ;;  %v718_v39 = vmul.f32 0.5, %v717_v5  ;;  %v649_v57 = vmul.f32 %v1723_v30, %v1653_v45  ;;  %v813_v45 = vand.u32 2147483647, %v1740_v60 }
 0x3df   :  { %v714_v17 = vsel %vm712_vm11, %v713_v62, %v711_v10  ;;  %v793_v19 = vadd.f32 %v1215_v49, %v792_v11  ;;  %v1769_v26 = vadd.f32 %v884_v15, %v1486_v13 }
 0x3e0   :  { %v1219_v18 = vpop.eup %1218  ;;  %v719_v59 = vsub.f32 1.5, %v718_v39  ;;  %v755_v20 = vadd.f32 1e-06, %v714_v17  ;;  %vm814_vm7 = vcmp.eq.f32.partialorder %v813_v45, 8.507059e+37  ;;  %v652_v17 = vmul.f32 %v1723_v30, %v1668_v52 }
 0x3e1   :  { %v805_v27 = vmul.f32 %v1219_v18, %v1740_v60  ;;  %v797_v29 = vsel %vm796_vm15, %v1215_v49, %v793_v19  ;;  %v899_v22 = vpack.c.bf16 %v1769_v26, %v1766_v23  ;;  %vm810_vm3 = vweird.f32 %v1219_v18 }
 0x3e2   :  { %v720_v28 = vmul.f32 %v1217_v61, %v719_v59  ;;  %1220 = vrcp.f32 %v755_v20  ;;  %v802_v13 = vsel %vm799_vm1, %v801_v31, %v797_v29  ;;  %vm811_vm6 = vmor %vm809_vm5, %vm810_vm3  ;;  %vm824_vm9 = vweird.f32 %v755_v20  ;;  %v1235_v29 = vld [vmem:[#allocation2 + $0x28] sm:$0xff] }
 0x3e3   :  { %v806_v32 = vsub.f32 1.0, %v805_v27  ;;  %1122 = vmatmul.msk.bf16.vlgmr.msrb.gmra.mxu0 %vm240_vm0, %v899_v22  ;;  %v803_v37 = vmul.f32 %v802_v13, %v649_v57  ;;  %v830_v53 = vand.u32 2147483648, %v755_v20  ;;  %v828_v2 = vand.u32 2147483647, %v755_v20  ;;  %v1234_v27 = vld [vmem:[#allocation2 + $0x20] sm:$0xff]  ;;  %v624_v57 = vpop.xlane.xlu2 %623 }
 0x3e4   :  { %v721_v12 = vmul.f32 %v720_v28, %v1708_v25  ;;  %v641_v52 = vmul.f32 %v1678_v14, %v624_v57 }
 0x3e5   :  { %v807_v35 = vmul.f32 %v1219_v18, %v806_v32  ;;  %v831_v7 = vor.u32 1.1754944e-38, %v830_v53  ;;  %vm829_vm11 = vcmp.eq.f32.partialorder %v828_v2, 8.507059e+37 }
 0x3e6   :  { %v723_v36 = vsel %vm722_vm2, %v1708_v25, %v721_v12  ;;  %v885_v25 = vadd.f32 %v1746_v24, %v803_v37  ;;  %vm734_vm1 = vcmp.eq.f32.partialorder %v641_v52, inf  ;;  %v737_v37 = vand.u32 2147483648, %v641_v52 }
 0x3e7   :  { %v808_v38 = vadd.f32 %v1219_v18, %v807_v35  ;;  %v726_v40 = vsel %vm724_vm4, %v725_v34, %v723_v36  ;;  %vm736_vm2 = vcmp.eq.f32.partialorder %v641_v52, 0.0 }
 0x3e8   :  { %v1221_v41 = vpop.eup %1220  ;;  %v756_v43 = vadd.f32 1e-06, %v726_v40  ;;  %v1789_v47 = vadd.f32 %v1232_v63, %v885_v25 }
 0x3e9   :  { %v812_v46 = vsel %vm811_vm6, %v1219_v18, %v808_v38  ;;  %v820_v48 = vmul.f32 %v1221_v41, %v755_v20  ;;  %vm825_vm8 = vweird.f32 %v1221_v41 }
 0x3ea   :  { %v817_v49 = vsel %vm814_vm7, %v816_v42, %v812_v46  ;;  %1222 = vrcp.f32 %v756_v43  ;;  %vm826_vm10 = vmor %vm824_vm9, %vm825_vm8  ;;  %v845_v9 = vand.u32 2147483648, %v756_v43  ;;  %v843_v39 = vand.u32 2147483647, %v756_v43 }
 0x3eb   :  { %v818_v56 = vmul.f32 %v817_v49, %v650_v44  ;;  %v821_v58 = vsub.f32 1.0, %v820_v48  ;;  %vm839_vm13 = vweird.f32 %v756_v43  ;;  %1224 = vrsqrt.f32 %v641_v52 }
 0x3ec   :  { %v846_v16 = vor.u32 1.1754944e-38, %v845_v9  ;;  %vm844_vm15 = vcmp.eq.f32.partialorder %v843_v39, 8.507059e+37  ;;  %v1146_v9 = vld [vmem:[#allocation8] sm:$0xff] }
 0x3ed   :  { %v886_v61 = vadd.f32 %v1746_v24, %v818_v56  ;;  %v822_v60 = vmul.f32 %v1221_v41, %v821_v58 }
 0x3ef   :  { %v1791_v51 = vadd.f32 %v1233_v0, %v886_v61  ;;  %v823_v1 = vadd.f32 %v1221_v41, %v822_v60 }
 0x3f0   :  { %v1223_v55 = vpop.eup %1222 }
 0x3f1   :  { %v900_v3 = vpack.c.bf16 %v1791_v51, %v1789_v47  ;;  %v827_v5 = vsel %vm826_vm10, %v1221_v41, %v823_v1  ;;  %v835_v6 = vmul.f32 %v1223_v55, %v756_v43  ;;  %vm840_vm12 = vweird.f32 %v1223_v55  ;;  %v1225_v32 = vpop.eup %1224 }
 0x3f2   :  { %v832_v8 = vsel %vm829_vm11, %v831_v7, %v827_v5  ;;  %vm841_vm14 = vmor %vm839_vm13, %vm840_vm12  ;;  %v728_v12 = vmul.f32 %v1225_v32, %v641_v52 }
 0x3f3   :  { %v836_v62 = vsub.f32 1.0, %v835_v6  ;;  %1123 = vmatmul.msk.bf16.gmra.mxu0 %vm240_vm0, %v900_v3  ;;  %v833_v11 = vmul.f32 %v832_v8, %v651_v54  ;;  %v1147_v3 = vld [vmem:[#allocation8 + $0x8] sm:$0xff] }
 0x3f4   :  { %v729_v13 = vmul.f32 %v1225_v32, %v728_v12  ;;  %1014 = vmatpush.bf16.msrb.mxu1 %v1147_v3 }
 0x3f5   :  { %v837_v10 = vmul.f32 %v1223_v55, %v836_v62  ;;  %v887_v20 = vadd.f32 %v1746_v24, %v833_v11  ;;  %v653_v11 = vmul.f32 %v1723_v30, %v1673_v4  ;;  %v1236_v4 = vld [vmem:[#allocation2 + $0x30] sm:$0xff] }
 0x3f6   :  { %v730_v33 = vmul.f32 0.5, %v729_v13 }
 0x3f7   :  { %v838_v15 = vadd.f32 %v1223_v55, %v837_v10  ;;  %v1802_v28 = vadd.f32 %v1234_v27, %v887_v20 }
 0x3f8   :  { %v731_v34 = vsub.f32 1.5, %v730_v33  ;;  %1015 = vmatpush.bf16.msrb.mxu1 %v1146_v9 }
 0x3f9   :  { %v842_v18 = vsel %vm841_vm14, %v1223_v55, %v838_v15 }
 0x3fa   :  { %v847_v59 = vsel %vm844_vm15, %v846_v16, %v842_v18  ;;  %v732_v35 = vmul.f32 %v1225_v32, %v731_v34 }
 0x3fb   :  { %v848_v19 = vmul.f32 %v847_v59, %v652_v17 }
 0x3fc   :  { %v733_v45 = vmul.f32 %v732_v35, %v641_v52 }
 0x3fd   :  { %v888_v50 = vadd.f32 %v1746_v24, %v848_v19  ;;  %v654_v19 = vmul.f32 %v1723_v30, %v1682_v21  ;;  %v1194_v30 = vld [vmem:[%s1866_s10] ss:$0 sm:$0xff] }
 0x3fe   :  { %v735_v36 = vsel %vm734_vm1, %v641_v52, %v733_v45  ;;  %v1237_v52 = vld [vmem:[#allocation2 + $0x38] sm:$0xff] }
 0x3ff   :  { %v1804_v31 = vadd.f32 %v1235_v29, %v888_v50  ;;  %v738_v41 = vsel %vm736_vm2, %v737_v37, %v735_v36 }
 0x400   :  { %v757_v42 = vadd.f32 1e-06, %v738_v41 }
 0x401   :  { %v901_v22 = vpack.c.bf16 %v1804_v31, %v1802_v28 }
 0x402   :  { %v860_v55 = vand.u32 2147483648, %v757_v42  ;;  %vm854_vm6 = vweird.f32 %v757_v42  ;;  %v858_v5 = vand.u32 2147483647, %v757_v42 }
 0x403   :  { %1124 = vmatmul.msk.bf16.gmra.mxu0 %vm240_vm0, %v901_v22 }
 0x404   :  { %v861_v8 = vor.u32 1.1754944e-38, %v860_v55  ;;  %vm859_vm8 = vcmp.eq.f32.partialorder %v858_v5, 8.507059e+37 }
 0x42b   :  { %v627_v38 = vpop.xlane.xlu0 %626 }
 0x42c   :  { %v642_v40 = vmul.f32 %v1678_v14, %v627_v38 }
 0x42e   :  { %1226 = vrsqrt.f32 %v642_v40  ;;  %vm746_vm3 = vcmp.eq.f32.partialorder %v642_v40, inf  ;;  %v749_v60 = vand.u32 2147483648, %v642_v40  ;;  %vm748_vm4 = vcmp.eq.f32.partialorder %v642_v40, 0.0 }
 0x42f   :  { %1228 = vrcp.f32 %v757_v42 }
 0x434   :  { %v1227_v43 = vpop.eup %1226 }
 0x435   :  { %v740_v44 = vmul.f32 %v1227_v43, %v642_v40  ;;  %v1229_v48 = vpop.eup %1228 }
 0x436   :  { %v850_v25 = vmul.f32 %v1229_v48, %v757_v42  ;;  %vm855_vm5 = vweird.f32 %v1229_v48 }
 0x437   :  { %v741_v46 = vmul.f32 %v1227_v43, %v740_v44  ;;  %vm856_vm7 = vmor %vm854_vm6, %vm855_vm5 }
 0x438   :  { %v851_v53 = vsub.f32 1.0, %v850_v25 }
 0x439   :  { %v742_v49 = vmul.f32 0.5, %v741_v46 }
 0x43a   :  { %v852_v1 = vmul.f32 %v1229_v48, %v851_v53 }
 0x43b   :  { %v743_v56 = vsub.f32 1.5, %v742_v49 }
 0x43c   :  { %v853_v2 = vadd.f32 %v1229_v48, %v852_v1 }
 0x43d   :  { %v744_v58 = vmul.f32 %v1227_v43, %v743_v56 }
 0x43e   :  { %v857_v7 = vsel %vm856_vm7, %v1229_v48, %v853_v2  ;;  %v1195_v2 = vld [vmem:[%s1868_s12] ss:$0 sm:$0xff]  ;;  %s1382_s12 = smov [#allocation10]  }
 0x43f   :  { %v745_v61 = vmul.f32 %v744_v58, %v642_v40  ;;  %v862_v10 = vsel %vm859_vm8, %v861_v8, %v857_v7  ;;  %s1057_s0 = sshll.u32 %s1382_s12, 4  ;;  %s1058_s0 = int_to_ptr.vmem [resolvable:$true] %s1057_s0 }
 0x440   :  { %v863_v17 = vmul.f32 %v862_v10, %v653_v11 }
 0x441   :  { %v747_v63 = vsel %vm746_vm3, %v642_v40, %v745_v61 }
 0x442   :  { %v750_v0 = vsel %vm748_vm4, %v749_v60, %v747_v63  ;;  %v889_v29 = vadd.f32 %v1746_v24, %v863_v17 }
 0x443   :  { %v758_v14 = vadd.f32 1e-06, %v750_v0 }
 0x444   :  { %v1817_v22 = vadd.f32 %v1236_v4, %v889_v29 }
 0x445   :  { %1230 = vrcp.f32 %v758_v14  ;;  %v875_v39 = vand.u32 2147483648, %v758_v14  ;;  %v873_v16 = vand.u32 2147483647, %v758_v14  ;;  %vm869_vm10 = vweird.f32 %v758_v14 }
 0x447   :  { %v876_v59 = vor.u32 1.1754944e-38, %v875_v39  ;;  %vm874_vm12 = vcmp.eq.f32.partialorder %v873_v16, 8.507059e+37 }
 0x44b   :  { %v1231_v6 = vpop.eup %1230 }
 0x44c   :  { %v865_v62 = vmul.f32 %v1231_v6, %v758_v14  ;;  %vm870_vm9 = vweird.f32 %v1231_v6 }
 0x44d   :  { %vm871_vm11 = vmor %vm869_vm10, %vm870_vm9 }
 0x44e   :  { %v866_v54 = vsub.f32 1.0, %v865_v62 }
 0x450   :  { %v867_v15 = vmul.f32 %v1231_v6, %v866_v54 }
 0x452   :  { %v868_v18 = vadd.f32 %v1231_v6, %v867_v15 }
 0x454   :  { %v872_v20 = vsel %vm871_vm11, %v1231_v6, %v868_v18 }
 0x455   :  { %v877_v50 = vsel %vm874_vm12, %v876_v59, %v872_v20 }
 0x456   :  { %v878_v27 = vmul.f32 %v877_v50, %v654_v19 }
 0x458   :  { %v890_v57 = vadd.f32 %v1746_v24, %v878_v27 }
 0x45a   :  { %v1819_v32 = vadd.f32 %v1237_v52, %v890_v57 }
 0x45c   :  { %v902_v12 = vpack.c.bf16 %v1819_v32, %v1817_v22 }
 0x45e   :  { %1125 = vmatmul.msk.bf16.gmra.mxu0 %vm240_vm0, %v902_v12 }
 0x460   :  { %v944_v21 = vpop.f32.mrf.mxu0 }
 0x461   :  { %v945_v13 = vadd.f32 %v1194_v30, %v944_v21 }
 0x463   :  { %v964_v24 = vmax.f32 %v945_v13, 0.0 }
 0x468   :  { %v946_v33 = vpop.f32.mrf.mxu0 }
 0x469   :  { %v947_v34 = vadd.f32 %v1194_v30, %v946_v33 }
 0x46b   :  { %v965_v35 = vmax.f32 %v947_v34, 0.0 }
 0x46d   :  { %v972_v45 = vpack.c.bf16 %v965_v35, %v964_v24 }
 0x46f   :  { %1134 = vmatmul.msk.bf16.vlgmr.msrb.gmra.mxu1 %vm240_vm0, %v972_v45 }
 0x470   :  { %v949_v36 = vpop.f32.mrf.mxu0 }
 0x471   :  { %v950_v37 = vadd.f32 %v1194_v30, %v949_v36 }
 0x473   :  { %v966_v41 = vmax.f32 %v950_v37, 0.0 }
 0x478   :  { %v951_v38 = vpop.f32.mrf.mxu0 }
 0x479   :  { %v952_v40 = vadd.f32 %v1194_v30, %v951_v38 }
 0x47b   :  { %v967_v42 = vmax.f32 %v952_v40, 0.0 }
 0x47d   :  { %v973_v43 = vpack.c.bf16 %v967_v42, %v966_v41 }
 0x47f   :  { %1135 = vmatmul.msk.bf16.gmra.mxu1 %vm240_vm0, %v973_v43 }
 0x480   :  { %v954_v44 = vpop.f32.mrf.mxu0 }
 0x481   :  { %v955_v46 = vadd.f32 %v1194_v30, %v954_v44 }
 0x483   :  { %v968_v56 = vmax.f32 %v955_v46, 0.0 }
 0x488   :  { %v956_v48 = vpop.f32.mrf.mxu0 }
 0x489   :  { %v957_v49 = vadd.f32 %v1194_v30, %v956_v48 }
 0x48b   :  { %v969_v25 = vmax.f32 %v957_v49, 0.0 }
 0x48d   :  { %v974_v58 = vpack.c.bf16 %v969_v25, %v968_v56 }
 0x48f   :  { %1136 = vmatmul.msk.bf16.gmra.mxu1 %vm240_vm0, %v974_v58 }
 0x4db   :  { %v959_v61 = vpop.f32.mrf.mxu0 }
 0x4dc   :  { %v960_v60 = vadd.f32 %v1194_v30, %v959_v61 }
 0x4de   :  { %v970_v0 = vmax.f32 %v960_v60, 0.0 }
 0x4e3   :  { %v961_v53 = vpop.f32.mrf.mxu0 }
 0x4e4   :  { %v962_v63 = vadd.f32 %v1194_v30, %v961_v53 }
 0x4e6   :  { %v971_v14 = vmax.f32 %v962_v63, 0.0 }
 0x4e8   :  { %v975_v1 = vpack.c.bf16 %v971_v14, %v970_v0 }
 0x4ea   :  { %1137 = vmatmul.msk.bf16.gmra.mxu1 %vm240_vm0, %v975_v1 }
 0x4ec   :  { %v1017_v55 = vpop.f32.mrf.mxu1 }
 0x4ed   :  { %v1018_v3 = vadd.f32 %v1195_v2, %v1017_v55 }
 0x4ef   :  { %v1037_v5 = vadd.f32 %v1018_v3, %v1766_v23 }
 0x4f1   :  { %1045 = vst.msk [vmem:[#allocation10] sm:$0xff] %vm240_vm0, %v1037_v5 }
 0x4f4   :  { %v1019_v6 = vpop.f32.mrf.mxu1 }
 0x4f5   :  { %v1020_v7 = vadd.f32 %v1195_v2, %v1019_v6 }
 0x4f7   :  { %v1038_v62 = vadd.f32 %v1020_v7, %v1769_v26 }
 0x4f9   :  { %1046 = vst.msk [vmem:[#allocation10 + $0x8] sm:$0xff] %vm240_vm0, %v1038_v62 }
 0x4fc   :  { %v1022_v8 = vpop.f32.mrf.mxu1 }
 0x4fd   :  { %v1023_v9 = vadd.f32 %v1195_v2, %v1022_v8 }
 0x4ff   :  { %v1039_v54 = vadd.f32 %v1023_v9, %v1789_v47 }
 0x501   :  { %1047 = vst.msk [vmem:[#allocation10 + $0x10] sm:$0xff] %vm240_vm0, %v1039_v54 }
 0x504   :  { %v1024_v10 = vpop.f32.mrf.mxu1 }
 0x505   :  { %v1025_v39 = vadd.f32 %v1195_v2, %v1024_v10 }
 0x507   :  { %v1040_v11 = vadd.f32 %v1025_v39, %v1791_v51 }
 0x509   :  { %1048 = vst.msk [vmem:[#allocation10 + $0x18] sm:$0xff] %vm240_vm0, %v1040_v11 }
 0x50c   :  { %v1027_v23 = vpop.f32.mrf.mxu1 }
 0x50d   :  { %v1028_v15 = vadd.f32 %v1195_v2, %v1027_v23 }
 0x50f   :  { %v1041_v16 = vadd.f32 %v1028_v15, %v1802_v28 }
 0x511   :  { %1049 = vst.msk [vmem:[#allocation10 + $0x20] sm:$0xff] %vm240_vm0, %v1041_v16 }
 0x514   :  { %v1029_v26 = vpop.f32.mrf.mxu1 }
 0x515   :  { %v1030_v17 = vadd.f32 %v1195_v2, %v1029_v26 }
 0x517   :  { %v1042_v18 = vadd.f32 %v1030_v17, %v1804_v31 }
 0x519   :  { %1050 = vst.msk [vmem:[#allocation10 + $0x28] sm:$0xff] %vm240_vm0, %v1042_v18 }
 0x567   :  { %v1032_v47 = vpop.f32.mrf.mxu1 }
 0x568   :  { %v1033_v59 = vadd.f32 %v1195_v2, %v1032_v47 }
 0x56a   :  { %v1043_v19 = vadd.f32 %v1033_v59, %v1817_v22 }
 0x56c   :  { %1051 = vst.msk [vmem:[#allocation10 + $0x30] sm:$0xff] %vm240_vm0, %v1043_v19 }
 0x56f   :  { %v1034_v51 = vpop.f32.mrf.mxu1 }
 0x570   :  { %v1035_v28 = vadd.f32 %v1195_v2, %v1034_v51 }
 0x572   :  { %v1044_v20 = vadd.f32 %v1035_v28, %v1819_v32 }
 0x574   :  { %1052 = vst.msk [vmem:[#allocation10 + $0x38] sm:$0xff] %vm240_vm0, %v1044_v20 }
 0x575   :  { %1065 = dma.vmem_to_hbm [thread:$0]  %s1058_s0, 1024, %s1060_s24, [#allocation4], %s1367_s16, %s1367_s16, %s1368_s17  }
 0x576   :  { %1364 = dma.done.wait [#allocation4], 1024  }
 0x577   :  { %1365 = vsyncadd [#allocation4], 4294966272 }
 0x578   :  { %1070 = vsyncpa [#allocation3], 1 }
 0x579   :  { %1071 = vsyncpa [#allocation6], 1 }
 0x57a   :  { %1072 = vsyncpa [#allocation9], 1 }
 0x57b   :  { %1073 = vsyncpa [#allocation4], 1 }

</bundles_post_ra>
